<compile_context>
chip_gen: v6e
topology: v6e:2x2x1
jax: 0.10.0
libtpu: 0.0.40
codegen_flags: <defaults>
</compile_context>

<pallas_src>
import functools

import jax
import jax.numpy as jnp
from jax import lax
from jax.experimental import pallas as pl
from jax.experimental.pallas import tpu as pltpu

NOISE_DIM = 100
HIDDEN_DIM = 64
SIGNAL_LENGTH = 128


def _round_up(x, m):
    return ((x + m - 1) // m) * m


def _sigmoid_1eup(x):
    # Exact identity: sigmoid(x) == 0.5 * tanh(0.5 * x) + 0.5.
    # tanh is a single EUP op; sigmoid may lower to exp + reciprocal (2 EUP
    # ops).  The extra mul/add goes to otherwise-idle VALU slots.
    return 0.5 * jnp.tanh(0.5 * x) + 0.5


def _eeg_gen_kernel(x_ref, wih_ref, whh_ref, bias_ref, wfc_ref, bfc_ref,
                    out_ref, h_scr, c_scr, gx_scr, hs_scr,
                    *, bp, tc, hp, unroll):
    """One time-chunk of TC steps.  Grid axis 0 = time chunks (sequential)."""
    ci = pl.program_id(0)

    @pl.when(ci == 0)
    def _():
        h_scr[...] = jnp.zeros_like(h_scr)
        c_scr[...] = jnp.zeros_like(c_scr)

    # (1) Hoisted input projection for the whole chunk (fills the MXU):
    #     (TC*BP, NP) @ (NP, 4*HP) + fused (b_ih + b_hh).
    gx_scr[...] = (jnp.dot(x_ref[...], wih_ref[...],
                           preferred_element_type=jnp.float32)
                   + bias_ref[...])

    whh = whh_ref[...]  # (HP, 4*HP): loop-invariant, loaded once per chunk

    # (2) Sequential LSTM recurrence; only h @ W_hh remains inside the loop.
    def step(t, carry):
        h, c = carry
        row = pl.multiple_of(t * bp, bp)  # 8-aligned sublane offset
        g = gx_scr[pl.ds(row, bp), :] + jnp.dot(
            h, whh, preferred_element_type=jnp.float32)
        # PyTorch gate order [i, f, g, o]; slices are full 128-lane vregs.
        i_g = _sigmoid_1eup(g[:, 0 * hp:1 * hp])
        f_g = _sigmoid_1eup(g[:, 1 * hp:2 * hp])
        g_g = jnp.tanh(g[:, 2 * hp:3 * hp])
        o_g = _sigmoid_1eup(g[:, 3 * hp:4 * hp])
        c_new = f_g * c + i_g * g_g
        h_new = o_g * jnp.tanh(c_new)
        hs_scr[pl.ds(row, bp), :] = h_new
        return h_new, c_new

    h_fin, c_fin = lax.fori_loop(0, tc, step, (h_scr[...], c_scr[...]),
                                 unroll=unroll)
    h_scr[...] = h_fin
    c_scr[...] = c_fin

    # (3) Hoisted fc + tanh over the whole chunk: (TC*BP, HP) @ (HP, S).
    out_ref[...] = jnp.tanh(
        jnp.dot(hs_scr[...], wfc_ref[...], preferred_element_type=jnp.float32)
        + bfc_ref[...])


def _pad_gate_cols(w, H, HP):
    """(K, 4H) -> (K, 4HP), zero-padding each gate block separately."""
    K = w.shape[0]
    out = jnp.zeros((K, 4 * HP), w.dtype)
    for g in range(4):
        out = out.at[:, g * HP: g * HP + H].set(w[:, g * H:(g + 1) * H])
    return out


@jax.jit
def eeg_generator_forward(noise, w_ih, w_hh, b_ih, b_hh, w_fc, b_fc):
    """noise: (B, T, N) f32.  Weights in PyTorch layout:
       w_ih (4H, N), w_hh (4H, H), b_ih (4H,), b_hh (4H,), w_fc (S, H), b_fc (S,).
    """
    B, T, N = noise.shape
    H = w_hh.shape[1]
    S = w_fc.shape[0]

    HP = _round_up(max(H, 128), 128)   # padded hidden: each gate = 1 vreg wide
    BP = _round_up(B, 8)               # padded batch: sublane-aligned rows
    NP = _round_up(N, 128)             # padded noise dim: lane-dense loads

    # Time chunk: cap at 128, pad T up to a multiple (no divisor constraint).
    TC = min(T, 128)
    T_pad = _round_up(T, TC)
    # Partial unroll of the recurrence: largest divisor of TC that is <= 8.
    UNROLL = max(u for u in range(1, 9) if TC % u == 0)

    f32 = jnp.float32

    # --- weight prep (one-time, outside the kernel) ---------------------------
    wih_t = jnp.asarray(w_ih, f32).T                          # (N, 4H)
    wih_p = _pad_gate_cols(wih_t, H, HP)                      # (N, 4HP)
    wih_p = jnp.pad(wih_p, ((0, NP - N), (0, 0)))             # (NP, 4HP)

    whh_t = jnp.asarray(w_hh, f32).T                          # (H, 4H)
    whh_p = _pad_gate_cols(whh_t, H, HP)                      # (H, 4HP)
    whh_p = jnp.pad(whh_p, ((0, HP - H), (0, 0)))             # (HP, 4HP)

    bias = (jnp.asarray(b_ih, f32) + jnp.asarray(b_hh, f32))[None, :]  # (1, 4H)
    bias_p = _pad_gate_cols(bias, H, HP)                      # (1, 4HP)

    wfc_t = jnp.asarray(w_fc, f32).T                          # (H, S)
    wfc_p = jnp.pad(wfc_t, ((0, HP - H), (0, 0)))             # (HP, S)
    bfc_p = jnp.asarray(b_fc, f32)[None, :]                   # (1, S)

    # --- input layout: time-major, time/batch/noise padded, flattened ---------
    # (swapaxes + pad are the only real HBM passes; the reshape is metadata.)
    x = jnp.swapaxes(jnp.asarray(noise, f32), 0, 1)           # (T, B, N)
    x = jnp.pad(x, ((0, T_pad - T), (0, BP - B), (0, NP - N)))  # (T_pad, BP, NP)
    x_flat = x.reshape(T_pad * BP, NP)                        # (T_pad*BP, NP)

    grid_spec = pltpu.PrefetchScalarGridSpec(
        num_scalar_prefetch=0,
        grid=(T_pad // TC,),
        in_specs=[
            pl.BlockSpec((TC * BP, NP), lambda c: (c, 0)),    # noise chunk
            pl.BlockSpec((NP, 4 * HP), lambda c: (0, 0)),     # W_ih^T
            pl.BlockSpec((HP, 4 * HP), lambda c: (0, 0)),     # W_hh^T
            pl.BlockSpec((1, 4 * HP), lambda c: (0, 0)),      # b_ih + b_hh
            pl.BlockSpec((HP, S), lambda c: (0, 0)),          # W_fc^T
            pl.BlockSpec((1, S), lambda c: (0, 0)),           # b_fc
        ],
        out_specs=pl.BlockSpec((TC * BP, S), lambda c: (c, 0)),
        scratch_shapes=[
            pltpu.VMEM((BP, HP), f32),           # h state (persists across chunks)
            pltpu.VMEM((BP, HP), f32),           # c state (persists across chunks)
            pltpu.VMEM((TC * BP, 4 * HP), f32),  # precomputed input-projected gates
            pltpu.VMEM((TC * BP, HP), f32),      # per-step hidden states of the chunk
        ],
    )

    kernel = functools.partial(_eeg_gen_kernel, bp=BP, tc=TC, hp=HP,
                               unroll=UNROLL)
    out_flat = pl.pallas_call(
        kernel,
        out_shape=jax.ShapeDtypeStruct((T_pad * BP, S), f32),
        grid_spec=grid_spec,
        compiler_params=pltpu.CompilerParams(
            # h/c carry across grid steps -> time axis MUST stay sequential.
            dimension_semantics=("arbitrary",),
            # ~5-6 MiB footprint at TC=128; 32 MiB is safe on v5e/v6e/v7x.
            vmem_limit_bytes=32 * 1024 * 1024),
    )(x_flat, wih_p, whh_p, bias_p, wfc_p, bfc_p)

    out = out_flat.reshape(T_pad, BP, S)[:T, :B, :]           # drop time/batch pad
    return jnp.swapaxes(out, 0, 1)                            # (B, T, S)


def _reference_forward(noise, w_ih, w_hh, b_ih, b_hh, w_fc, b_fc):
    """Pure-JAX reference matching torch.nn.LSTM(batch_first=True) + Linear + tanh."""
    B, T, N = noise.shape
    H = w_hh.shape[1]

    def step(carry, x_t):
        h, c = carry
        gates = x_t @ w_ih.T + b_ih + h @ w_hh.T + b_hh
        i_g = jax.nn.sigmoid(gates[:, 0 * H:1 * H])
        f_g = jax.nn.sigmoid(gates[:, 1 * H:2 * H])
        g_g = jnp.tanh(gates[:, 2 * H:3 * H])
        o_g = jax.nn.sigmoid(gates[:, 3 * H:4 * H])
        c_new = f_g * c + i_g * g_g
        h_new = o_g * jnp.tanh(c_new)
        return (h_new, c_new), h_new

    h0 = jnp.zeros((B, H), jnp.float32)
    c0 = jnp.zeros((B, H), jnp.float32)
    _, hs = lax.scan(step, (h0, c0), jnp.swapaxes(noise, 0, 1))  # (T, B, H)
    out = jnp.tanh(hs @ w_fc.T + b_fc)                           # (T, B, S)
    return jnp.swapaxes(out, 0, 1)                               # (B, T, S)


if __name__ == "__main__":
    B, T = 2, 8
    N, H, S = NOISE_DIM, HIDDEN_DIM, SIGNAL_LENGTH

    key = jax.random.PRNGKey(0)
    ks = jax.random.split(key, 7)
    bound = 1.0 / jnp.sqrt(H)  # PyTorch-style uniform(-1/sqrt(H), 1/sqrt(H))

    w_ih = jax.random.uniform(ks[0], (4 * H, N), jnp.float32, -bound, bound)
    w_hh = jax.random.uniform(ks[1], (4 * H, H), jnp.float32, -bound, bound)
    b_ih = jax.random.uniform(ks[2], (4 * H,), jnp.float32, -bound, bound)
    b_hh = jax.random.uniform(ks[3], (4 * H,), jnp.float32, -bound, bound)
    w_fc = jax.random.uniform(ks[4], (S, H), jnp.float32, -bound, bound)
    b_fc = jax.random.uniform(ks[5], (S,), jnp.float32, -bound, bound)

    noise = jax.random.normal(ks[6], (B, T, N), jnp.float32)

    out = eeg_generator_forward(noise, w_ih, w_hh, b_ih, b_hh, w_fc, b_fc)
    out = jax.block_until_ready(out)

    ref = _reference_forward(noise, w_ih, w_hh, b_ih, b_hh, w_fc, b_fc)
    assert out.shape == (B, T, S), out.shape
    err = float(jnp.max(jnp.abs(out - ref)))
    assert err < 1e-4, err

    print("KERNEL_OK")
</pallas_src>

<mosaic_0001>
module attributes {stable_mosaic.version = 11 : i64} {
  func.func @_eeg_gen_kernel(%arg0: i32, %arg1: memref<64x128xf32, #tpu.memory_space<vmem>>, %arg2: memref<128x512xf32, #tpu.memory_space<vmem>>, %arg3: memref<128x512xf32, #tpu.memory_space<vmem>>, %arg4: memref<1x512xf32, #tpu.memory_space<vmem>>, %arg5: memref<128x128xf32, #tpu.memory_space<vmem>>, %arg6: memref<1x128xf32, #tpu.memory_space<vmem>>, %arg7: memref<64x128xf32, #tpu.memory_space<vmem>>, %arg8: memref<8x128xf32, #tpu.memory_space<vmem>>, %arg9: memref<8x128xf32, #tpu.memory_space<vmem>>, %arg10: memref<64x512xf32, #tpu.memory_space<vmem>>, %arg11: memref<64x128xf32, #tpu.memory_space<vmem>>) attributes {dimension_semantics = [#tpu.dimension_semantics<arbitrary>], iteration_bounds = array<i64: 1>, scalar_prefetch = 0 : i64, scratch_operands = 4 : i64, tpu.core_type = #tpu.core_type<tc>, window_params = [{transform_indices = @transform_0, window_bounds = array<i64: 64, 128>}, {pipeline_mode = #tpu.pipeline_mode<synchronous>, transform_indices = @transform_1, window_bounds = array<i64: 128, 512>}, {pipeline_mode = #tpu.pipeline_mode<synchronous>, transform_indices = @transform_2, window_bounds = array<i64: 128, 512>}, {pipeline_mode = #tpu.pipeline_mode<synchronous>, transform_indices = @transform_3, window_bounds = array<i64: 1, 512>}, {pipeline_mode = #tpu.pipeline_mode<synchronous>, transform_indices = @transform_4, window_bounds = array<i64: 128, 128>}, {pipeline_mode = #tpu.pipeline_mode<synchronous>, transform_indices = @transform_5, window_bounds = array<i64: 1, 128>}, {transform_indices = @transform_6, window_bounds = array<i64: 64, 128>}]} {
    %c0_i32 = arith.constant 0 : i32
    %0 = arith.cmpi eq, %arg0, %c0_i32 : i32
    %1 = arith.extui %0 : i1 to i32
    %c0_i32_0 = arith.constant 0 : i32
    %2 = arith.cmpi ne, %1, %c0_i32_0 : i32
    scf.if %2 {
      %cst_132 = arith.constant 0.000000e+00 : f32
      %335 = vector.broadcast %cst_132 : f32 to vector<8x128xf32>
      %c0_133 = arith.constant 0 : index
      %c0_134 = arith.constant 0 : index
      %336 = vector.load %arg8[%c0_133, %c0_134] : memref<8x128xf32, #tpu.memory_space<vmem>>, vector<8x128xf32>
      tpu.vector_store %arg8[%c0_133, %c0_134], %335 {strides = array<i32>} : memref<8x128xf32, #tpu.memory_space<vmem>>, vector<8x128xf32>,
      %cst_135 = arith.constant 0.000000e+00 : f32
      %337 = vector.broadcast %cst_135 : f32 to vector<8x128xf32>
      %c0_136 = arith.constant 0 : index
      %c0_137 = arith.constant 0 : index
      %338 = vector.load %arg9[%c0_136, %c0_137] : memref<8x128xf32, #tpu.memory_space<vmem>>, vector<8x128xf32>
      tpu.vector_store %arg9[%c0_136, %c0_137], %337 {strides = array<i32>} : memref<8x128xf32, #tpu.memory_space<vmem>>, vector<8x128xf32>,
    } else {
    }
    %c0 = arith.constant 0 : index
    %c0_1 = arith.constant 0 : index
    %3 = vector.load %arg1[%c0, %c0_1] : memref<64x128xf32, #tpu.memory_space<vmem>>, vector<64x128xf32>
    %c0_2 = arith.constant 0 : index
    %c0_3 = arith.constant 0 : index
    %4 = vector.load %arg2[%c0_2, %c0_3] : memref<128x512xf32, #tpu.memory_space<vmem>>, vector<128x512xf32>
    %cst = arith.constant dense<0.000000e+00> : vector<64x512xf32>
    %5 = tpu.matmul %3, %4, %cst {dimension_numbers = #tpu.dot_dimension_numbers<[1], [0], [0], [1], [0, 0, 1, 1], [], []>} : vector<64x128xf32>, vector<128x512xf32>, vector<64x512xf32> -> vector<64x512xf32>
    %c0_4 = arith.constant 0 : index
    %c0_5 = arith.constant 0 : index
    %6 = vector.load %arg4[%c0_4, %c0_5] : memref<1x512xf32, #tpu.memory_space<vmem>>, vector<1x512xf32>
    %7 = vector.broadcast %6 : vector<1x512xf32> to vector<64x512xf32>
    %8 = arith.addf %5, %7 : vector<64x512xf32>
    %c0_6 = arith.constant 0 : index
    %c0_7 = arith.constant 0 : index
    %9 = vector.load %arg10[%c0_6, %c0_7] : memref<64x512xf32, #tpu.memory_space<vmem>>, vector<64x512xf32>
    tpu.vector_store %arg10[%c0_6, %c0_7], %8 {strides = array<i32>} : memref<64x512xf32, #tpu.memory_space<vmem>>, vector<64x512xf32>,
    %c0_8 = arith.constant 0 : index
    %c0_9 = arith.constant 0 : index
    %10 = vector.load %arg3[%c0_8, %c0_9] : memref<128x512xf32, #tpu.memory_space<vmem>>, vector<128x512xf32>
    %c0_10 = arith.constant 0 : index
    %c0_11 = arith.constant 0 : index
    %11 = vector.load %arg8[%c0_10, %c0_11] : memref<8x128xf32, #tpu.memory_space<vmem>>, vector<8x128xf32>
    %c0_12 = arith.constant 0 : index
    %c0_13 = arith.constant 0 : index
    %12 = vector.load %arg9[%c0_12, %c0_13] : memref<8x128xf32, #tpu.memory_space<vmem>>, vector<8x128xf32>
    %c0_i32_14 = arith.constant 0 : i32
    %c8_i32 = arith.constant 8 : i32
    %13 = arith.muli %c0_i32_14, %c8_i32 : i32
    %14 = tpu.assume_multiple %13, 8 : i32
    %15 = arith.index_cast %14 : i32 to index
    %c0_15 = arith.constant 0 : index
    %16 = vector.load %arg10[%15, %c0_15] : memref<64x512xf32, #tpu.memory_space<vmem>>, vector<8x512xf32>
    %cst_16 = arith.constant dense<0.000000e+00> : vector<8x512xf32>
    %17 = tpu.matmul %11, %10, %cst_16 {dimension_numbers = #tpu.dot_dimension_numbers<[1], [0], [0], [1], [0, 0, 1, 1], [], []>} : vector<8x128xf32>, vector<128x512xf32>, vector<8x512xf32> -> vector<8x512xf32>
    %18 = arith.addf %16, %17 : vector<8x512xf32>
    %19 = vector.extract_strided_slice %18 {offsets = [0, 0], sizes = [8, 128], strides = [1, 1]} : vector<8x512xf32> to vector<8x128xf32>
    %cst_17 = arith.constant 5.000000e-01 : f32
    %20 = vector.broadcast %cst_17 : f32 to vector<8x128xf32>
    %21 = arith.mulf %20, %19 : vector<8x128xf32>
    %22 = math.tanh %21 : vector<8x128xf32>
    %cst_18 = arith.constant 5.000000e-01 : f32
    %23 = vector.broadcast %cst_18 : f32 to vector<8x128xf32>
    %24 = arith.mulf %23, %22 : vector<8x128xf32>
    %cst_19 = arith.constant 5.000000e-01 : f32
    %25 = vector.broadcast %cst_19 : f32 to vector<8x128xf32>
    %26 = arith.addf %24, %25 : vector<8x128xf32>
    %27 = vector.extract_strided_slice %18 {offsets = [0, 128], sizes = [8, 128], strides = [1, 1]} : vector<8x512xf32> to vector<8x128xf32>
    %cst_20 = arith.constant 5.000000e-01 : f32
    %28 = vector.broadcast %cst_20 : f32 to vector<8x128xf32>
    %29 = arith.mulf %28, %27 : vector<8x128xf32>
    %30 = math.tanh %29 : vector<8x128xf32>
    %cst_21 = arith.constant 5.000000e-01 : f32
    %31 = vector.broadcast %cst_21 : f32 to vector<8x128xf32>
    %32 = arith.mulf %31, %30 : vector<8x128xf32>
    %cst_22 = arith.constant 5.000000e-01 : f32
    %33 = vector.broadcast %cst_22 : f32 to vector<8x128xf32>
    %34 = arith.addf %32, %33 : vector<8x128xf32>
    %35 = vector.extract_strided_slice %18 {offsets = [0, 256], sizes = [8, 128], strides = [1, 1]} : vector<8x512xf32> to vector<8x128xf32>
    %36 = math.tanh %35 : vector<8x128xf32>
    %37 = vector.extract_strided_slice %18 {offsets = [0, 384], sizes = [8, 128], strides = [1, 1]} : vector<8x512xf32> to vector<8x128xf32>
    %cst_23 = arith.constant 5.000000e-01 : f32
    %38 = vector.broadcast %cst_23 : f32 to vector<8x128xf32>
    %39 = arith.mulf %38, %37 : vector<8x128xf32>
    %40 = math.tanh %39 : vector<8x128xf32>
    %cst_24 = arith.constant 5.000000e-01 : f32
    %41 = vector.broadcast %cst_24 : f32 to vector<8x128xf32>
    %42 = arith.mulf %41, %40 : vector<8x128xf32>
    %cst_25 = arith.constant 5.000000e-01 : f32
    %43 = vector.broadcast %cst_25 : f32 to vector<8x128xf32>
    %44 = arith.addf %42, %43 : vector<8x128xf32>
    %45 = arith.mulf %34, %12 : vector<8x128xf32>
    %46 = arith.mulf %26, %36 : vector<8x128xf32>
    %47 = arith.addf %45, %46 : vector<8x128xf32>
    %48 = math.tanh %47 : vector<8x128xf32>
    %49 = arith.mulf %44, %48 : vector<8x128xf32>
    %50 = arith.index_cast %14 : i32 to index
    %c0_26 = arith.constant 0 : index
    %51 = vector.load %arg11[%50, %c0_26] : memref<64x128xf32, #tpu.memory_space<vmem>>, vector<8x128xf32>
    tpu.vector_store %arg11[%50, %c0_26], %49 {strides = array<i32>} : memref<64x128xf32, #tpu.memory_space<vmem>>, vector<8x128xf32>,
    %c1_i32 = arith.constant 1 : i32
    %c8_i32_27 = arith.constant 8 : i32
    %52 = arith.muli %c1_i32, %c8_i32_27 : i32
    %53 = tpu.assume_multiple %52, 8 : i32
    %54 = arith.index_cast %53 : i32 to index
    %c0_28 = arith.constant 0 : index
    %55 = vector.load %arg10[%54, %c0_28] : memref<64x512xf32, #tpu.memory_space<vmem>>, vector<8x512xf32>
    %cst_29 = arith.constant dense<0.000000e+00> : vector<8x512xf32>
    %56 = tpu.matmul %49, %10, %cst_29 {dimension_numbers = #tpu.dot_dimension_numbers<[1], [0], [0], [1], [0, 0, 1, 1], [], []>} : vector<8x128xf32>, vector<128x512xf32>, vector<8x512xf32> -> vector<8x512xf32>
    %57 = arith.addf %55, %56 : vector<8x512xf32>
    %58 = vector.extract_strided_slice %57 {offsets = [0, 0], sizes = [8, 128], strides = [1, 1]} : vector<8x512xf32> to vector<8x128xf32>
    %cst_30 = arith.constant 5.000000e-01 : f32
    %59 = vector.broadcast %cst_30 : f32 to vector<8x128xf32>
    %60 = arith.mulf %59, %58 : vector<8x128xf32>
    %61 = math.tanh %60 : vector<8x128xf32>
    %cst_31 = arith.constant 5.000000e-01 : f32
    %62 = vector.broadcast %cst_31 : f32 to vector<8x128xf32>
    %63 = arith.mulf %62, %61 : vector<8x128xf32>
    %cst_32 = arith.constant 5.000000e-01 : f32
    %64 = vector.broadcast %cst_32 : f32 to vector<8x128xf32>
    %65 = arith.addf %63, %64 : vector<8x128xf32>
    %66 = vector.extract_strided_slice %57 {offsets = [0, 128], sizes = [8, 128], strides = [1, 1]} : vector<8x512xf32> to vector<8x128xf32>
    %cst_33 = arith.constant 5.000000e-01 : f32
    %67 = vector.broadcast %cst_33 : f32 to vector<8x128xf32>
    %68 = arith.mulf %67, %66 : vector<8x128xf32>
    %69 = math.tanh %68 : vector<8x128xf32>
    %cst_34 = arith.constant 5.000000e-01 : f32
    %70 = vector.broadcast %cst_34 : f32 to vector<8x128xf32>
    %71 = arith.mulf %70, %69 : vector<8x128xf32>
    %cst_35 = arith.constant 5.000000e-01 : f32
    %72 = vector.broadcast %cst_35 : f32 to vector<8x128xf32>
    %73 = arith.addf %71, %72 : vector<8x128xf32>
    %74 = vector.extract_strided_slice %57 {offsets = [0, 256], sizes = [8, 128], strides = [1, 1]} : vector<8x512xf32> to vector<8x128xf32>
    %75 = math.tanh %74 : vector<8x128xf32>
    %76 = vector.extract_strided_slice %57 {offsets = [0, 384], sizes = [8, 128], strides = [1, 1]} : vector<8x512xf32> to vector<8x128xf32>
    %cst_36 = arith.constant 5.000000e-01 : f32
    %77 = vector.broadcast %cst_36 : f32 to vector<8x128xf32>
    %78 = arith.mulf %77, %76 : vector<8x128xf32>
    %79 = math.tanh %78 : vector<8x128xf32>
    %cst_37 = arith.constant 5.000000e-01 : f32
    %80 = vector.broadcast %cst_37 : f32 to vector<8x128xf32>
    %81 = arith.mulf %80, %79 : vector<8x128xf32>
    %cst_38 = arith.constant 5.000000e-01 : f32
    %82 = vector.broadcast %cst_38 : f32 to vector<8x128xf32>
    %83 = arith.addf %81, %82 : vector<8x128xf32>
    %84 = arith.mulf %73, %47 : vector<8x128xf32>
    %85 = arith.mulf %65, %75 : vector<8x128xf32>
    %86 = arith.addf %84, %85 : vector<8x128xf32>
    %87 = math.tanh %86 : vector<8x128xf32>
    %88 = arith.mulf %83, %87 : vector<8x128xf32>
    %89 = arith.index_cast %53 : i32 to index
    %c0_39 = arith.constant 0 : index
    %90 = vector.load %arg11[%89, %c0_39] : memref<64x128xf32, #tpu.memory_space<vmem>>, vector<8x128xf32>
    tpu.vector_store %arg11[%89, %c0_39], %88 {strides = array<i32>} : memref<64x128xf32, #tpu.memory_space<vmem>>, vector<8x128xf32>,
    %c2_i32 = arith.constant 2 : i32
    %c8_i32_40 = arith.constant 8 : i32
    %91 = arith.muli %c2_i32, %c8_i32_40 : i32
    %92 = tpu.assume_multiple %91, 8 : i32
    %93 = arith.index_cast %92 : i32 to index
    %c0_41 = arith.constant 0 : index
    %94 = vector.load %arg10[%93, %c0_41] : memref<64x512xf32, #tpu.memory_space<vmem>>, vector<8x512xf32>
    %cst_42 = arith.constant dense<0.000000e+00> : vector<8x512xf32>
    %95 = tpu.matmul %88, %10, %cst_42 {dimension_numbers = #tpu.dot_dimension_numbers<[1], [0], [0], [1], [0, 0, 1, 1], [], []>} : vector<8x128xf32>, vector<128x512xf32>, vector<8x512xf32> -> vector<8x512xf32>
    %96 = arith.addf %94, %95 : vector<8x512xf32>
    %97 = vector.extract_strided_slice %96 {offsets = [0, 0], sizes = [8, 128], strides = [1, 1]} : vector<8x512xf32> to vector<8x128xf32>
    %cst_43 = arith.constant 5.000000e-01 : f32
    %98 = vector.broadcast %cst_43 : f32 to vector<8x128xf32>
    %99 = arith.mulf %98, %97 : vector<8x128xf32>
    %100 = math.tanh %99 : vector<8x128xf32>
    %cst_44 = arith.constant 5.000000e-01 : f32
    %101 = vector.broadcast %cst_44 : f32 to vector<8x128xf32>
    %102 = arith.mulf %101, %100 : vector<8x128xf32>
    %cst_45 = arith.constant 5.000000e-01 : f32
    %103 = vector.broadcast %cst_45 : f32 to vector<8x128xf32>
    %104 = arith.addf %102, %103 : vector<8x128xf32>
    %105 = vector.extract_strided_slice %96 {offsets = [0, 128], sizes = [8, 128], strides = [1, 1]} : vector<8x512xf32> to vector<8x128xf32>
    %cst_46 = arith.constant 5.000000e-01 : f32
    %106 = vector.broadcast %cst_46 : f32 to vector<8x128xf32>
    %107 = arith.mulf %106, %105 : vector<8x128xf32>
    %108 = math.tanh %107 : vector<8x128xf32>
    %cst_47 = arith.constant 5.000000e-01 : f32
    %109 = vector.broadcast %cst_47 : f32 to vector<8x128xf32>
    %110 = arith.mulf %109, %108 : vector<8x128xf32>
    %cst_48 = arith.constant 5.000000e-01 : f32
    %111 = vector.broadcast %cst_48 : f32 to vector<8x128xf32>
    %112 = arith.addf %110, %111 : vector<8x128xf32>
    %113 = vector.extract_strided_slice %96 {offsets = [0, 256], sizes = [8, 128], strides = [1, 1]} : vector<8x512xf32> to vector<8x128xf32>
    %114 = math.tanh %113 : vector<8x128xf32>
    %115 = vector.extract_strided_slice %96 {offsets = [0, 384], sizes = [8, 128], strides = [1, 1]} : vector<8x512xf32> to vector<8x128xf32>
    %cst_49 = arith.constant 5.000000e-01 : f32
    %116 = vector.broadcast %cst_49 : f32 to vector<8x128xf32>
    %117 = arith.mulf %116, %115 : vector<8x128xf32>
    %118 = math.tanh %117 : vector<8x128xf32>
    %cst_50 = arith.constant 5.000000e-01 : f32
    %119 = vector.broadcast %cst_50 : f32 to vector<8x128xf32>
    %120 = arith.mulf %119, %118 : vector<8x128xf32>
    %cst_51 = arith.constant 5.000000e-01 : f32
    %121 = vector.broadcast %cst_51 : f32 to vector<8x128xf32>
    %122 = arith.addf %120, %121 : vector<8x128xf32>
    %123 = arith.mulf %112, %86 : vector<8x128xf32>
    %124 = arith.mulf %104, %114 : vector<8x128xf32>
    %125 = arith.addf %123, %124 : vector<8x128xf32>
    %126 = math.tanh %125 : vector<8x128xf32>
    %127 = arith.mulf %122, %126 : vector<8x128xf32>
    %128 = arith.index_cast %92 : i32 to index
    %c0_52 = arith.constant 0 : index
    %129 = vector.load %arg11[%128, %c0_52] : memref<64x128xf32, #tpu.memory_space<vmem>>, vector<8x128xf32>
    tpu.vector_store %arg11[%128, %c0_52], %127 {strides = array<i32>} : memref<64x128xf32, #tpu.memory_space<vmem>>, vector<8x128xf32>,
    %c3_i32 = arith.constant 3 : i32
    %c8_i32_53 = arith.constant 8 : i32
    %130 = arith.muli %c3_i32, %c8_i32_53 : i32
    %131 = tpu.assume_multiple %130, 8 : i32
    %132 = arith.index_cast %131 : i32 to index
    %c0_54 = arith.constant 0 : index
    %133 = vector.load %arg10[%132, %c0_54] : memref<64x512xf32, #tpu.memory_space<vmem>>, vector<8x512xf32>
    %cst_55 = arith.constant dense<0.000000e+00> : vector<8x512xf32>
    %134 = tpu.matmul %127, %10, %cst_55 {dimension_numbers = #tpu.dot_dimension_numbers<[1], [0], [0], [1], [0, 0, 1, 1], [], []>} : vector<8x128xf32>, vector<128x512xf32>, vector<8x512xf32> -> vector<8x512xf32>
    %135 = arith.addf %133, %134 : vector<8x512xf32>
    %136 = vector.extract_strided_slice %135 {offsets = [0, 0], sizes = [8, 128], strides = [1, 1]} : vector<8x512xf32> to vector<8x128xf32>
    %cst_56 = arith.constant 5.000000e-01 : f32
    %137 = vector.broadcast %cst_56 : f32 to vector<8x128xf32>
    %138 = arith.mulf %137, %136 : vector<8x128xf32>
    %139 = math.tanh %138 : vector<8x128xf32>
    %cst_57 = arith.constant 5.000000e-01 : f32
    %140 = vector.broadcast %cst_57 : f32 to vector<8x128xf32>
    %141 = arith.mulf %140, %139 : vector<8x128xf32>
    %cst_58 = arith.constant 5.000000e-01 : f32
    %142 = vector.broadcast %cst_58 : f32 to vector<8x128xf32>
    %143 = arith.addf %141, %142 : vector<8x128xf32>
    %144 = vector.extract_strided_slice %135 {offsets = [0, 128], sizes = [8, 128], strides = [1, 1]} : vector<8x512xf32> to vector<8x128xf32>
    %cst_59 = arith.constant 5.000000e-01 : f32
    %145 = vector.broadcast %cst_59 : f32 to vector<8x128xf32>
    %146 = arith.mulf %145, %144 : vector<8x128xf32>
    %147 = math.tanh %146 : vector<8x128xf32>
    %cst_60 = arith.constant 5.000000e-01 : f32
    %148 = vector.broadcast %cst_60 : f32 to vector<8x128xf32>
    %149 = arith.mulf %148, %147 : vector<8x128xf32>
    %cst_61 = arith.constant 5.000000e-01 : f32
    %150 = vector.broadcast %cst_61 : f32 to vector<8x128xf32>
    %151 = arith.addf %149, %150 : vector<8x128xf32>
    %152 = vector.extract_strided_slice %135 {offsets = [0, 256], sizes = [8, 128], strides = [1, 1]} : vector<8x512xf32> to vector<8x128xf32>
    %153 = math.tanh %152 : vector<8x128xf32>
    %154 = vector.extract_strided_slice %135 {offsets = [0, 384], sizes = [8, 128], strides = [1, 1]} : vector<8x512xf32> to vector<8x128xf32>
    %cst_62 = arith.constant 5.000000e-01 : f32
    %155 = vector.broadcast %cst_62 : f32 to vector<8x128xf32>
    %156 = arith.mulf %155, %154 : vector<8x128xf32>
    %157 = math.tanh %156 : vector<8x128xf32>
    %cst_63 = arith.constant 5.000000e-01 : f32
    %158 = vector.broadcast %cst_63 : f32 to vector<8x128xf32>
    %159 = arith.mulf %158, %157 : vector<8x128xf32>
    %cst_64 = arith.constant 5.000000e-01 : f32
    %160 = vector.broadcast %cst_64 : f32 to vector<8x128xf32>
    %161 = arith.addf %159, %160 : vector<8x128xf32>
    %162 = arith.mulf %151, %125 : vector<8x128xf32>
    %163 = arith.mulf %143, %153 : vector<8x128xf32>
    %164 = arith.addf %162, %163 : vector<8x128xf32>
    %165 = math.tanh %164 : vector<8x128xf32>
    %166 = arith.mulf %161, %165 : vector<8x128xf32>
    %167 = arith.index_cast %131 : i32 to index
    %c0_65 = arith.constant 0 : index
    %168 = vector.load %arg11[%167, %c0_65] : memref<64x128xf32, #tpu.memory_space<vmem>>, vector<8x128xf32>
    tpu.vector_store %arg11[%167, %c0_65], %166 {strides = array<i32>} : memref<64x128xf32, #tpu.memory_space<vmem>>, vector<8x128xf32>,
    %c4_i32 = arith.constant 4 : i32
    %c8_i32_66 = arith.constant 8 : i32
    %169 = arith.muli %c4_i32, %c8_i32_66 : i32
    %170 = tpu.assume_multiple %169, 8 : i32
    %171 = arith.index_cast %170 : i32 to index
    %c0_67 = arith.constant 0 : index
    %172 = vector.load %arg10[%171, %c0_67] : memref<64x512xf32, #tpu.memory_space<vmem>>, vector<8x512xf32>
    %cst_68 = arith.constant dense<0.000000e+00> : vector<8x512xf32>
    %173 = tpu.matmul %166, %10, %cst_68 {dimension_numbers = #tpu.dot_dimension_numbers<[1], [0], [0], [1], [0, 0, 1, 1], [], []>} : vector<8x128xf32>, vector<128x512xf32>, vector<8x512xf32> -> vector<8x512xf32>
    %174 = arith.addf %172, %173 : vector<8x512xf32>
    %175 = vector.extract_strided_slice %174 {offsets = [0, 0], sizes = [8, 128], strides = [1, 1]} : vector<8x512xf32> to vector<8x128xf32>
    %cst_69 = arith.constant 5.000000e-01 : f32
    %176 = vector.broadcast %cst_69 : f32 to vector<8x128xf32>
    %177 = arith.mulf %176, %175 : vector<8x128xf32>
    %178 = math.tanh %177 : vector<8x128xf32>
    %cst_70 = arith.constant 5.000000e-01 : f32
    %179 = vector.broadcast %cst_70 : f32 to vector<8x128xf32>
    %180 = arith.mulf %179, %178 : vector<8x128xf32>
    %cst_71 = arith.constant 5.000000e-01 : f32
    %181 = vector.broadcast %cst_71 : f32 to vector<8x128xf32>
    %182 = arith.addf %180, %181 : vector<8x128xf32>
    %183 = vector.extract_strided_slice %174 {offsets = [0, 128], sizes = [8, 128], strides = [1, 1]} : vector<8x512xf32> to vector<8x128xf32>
    %cst_72 = arith.constant 5.000000e-01 : f32
    %184 = vector.broadcast %cst_72 : f32 to vector<8x128xf32>
    %185 = arith.mulf %184, %183 : vector<8x128xf32>
    %186 = math.tanh %185 : vector<8x128xf32>
    %cst_73 = arith.constant 5.000000e-01 : f32
    %187 = vector.broadcast %cst_73 : f32 to vector<8x128xf32>
    %188 = arith.mulf %187, %186 : vector<8x128xf32>
    %cst_74 = arith.constant 5.000000e-01 : f32
    %189 = vector.broadcast %cst_74 : f32 to vector<8x128xf32>
    %190 = arith.addf %188, %189 : vector<8x128xf32>
    %191 = vector.extract_strided_slice %174 {offsets = [0, 256], sizes = [8, 128], strides = [1, 1]} : vector<8x512xf32> to vector<8x128xf32>
    %192 = math.tanh %191 : vector<8x128xf32>
    %193 = vector.extract_strided_slice %174 {offsets = [0, 384], sizes = [8, 128], strides = [1, 1]} : vector<8x512xf32> to vector<8x128xf32>
    %cst_75 = arith.constant 5.000000e-01 : f32
    %194 = vector.broadcast %cst_75 : f32 to vector<8x128xf32>
    %195 = arith.mulf %194, %193 : vector<8x128xf32>
    %196 = math.tanh %195 : vector<8x128xf32>
    %cst_76 = arith.constant 5.000000e-01 : f32
    %197 = vector.broadcast %cst_76 : f32 to vector<8x128xf32>
    %198 = arith.mulf %197, %196 : vector<8x128xf32>
    %cst_77 = arith.constant 5.000000e-01 : f32
    %199 = vector.broadcast %cst_77 : f32 to vector<8x128xf32>
    %200 = arith.addf %198, %199 : vector<8x128xf32>
    %201 = arith.mulf %190, %164 : vector<8x128xf32>
    %202 = arith.mulf %182, %192 : vector<8x128xf32>
    %203 = arith.addf %201, %202 : vector<8x128xf32>
    %204 = math.tanh %203 : vector<8x128xf32>
    %205 = arith.mulf %200, %204 : vector<8x128xf32>
    %206 = arith.index_cast %170 : i32 to index
    %c0_78 = arith.constant 0 : index
    %207 = vector.load %arg11[%206, %c0_78] : memref<64x128xf32, #tpu.memory_space<vmem>>, vector<8x128xf32>
    tpu.vector_store %arg11[%206, %c0_78], %205 {strides = array<i32>} : memref<64x128xf32, #tpu.memory_space<vmem>>, vector<8x128xf32>,
    %c5_i32 = arith.constant 5 : i32
    %c8_i32_79 = arith.constant 8 : i32
    %208 = arith.muli %c5_i32, %c8_i32_79 : i32
    %209 = tpu.assume_multiple %208, 8 : i32
    %210 = arith.index_cast %209 : i32 to index
    %c0_80 = arith.constant 0 : index
    %211 = vector.load %arg10[%210, %c0_80] : memref<64x512xf32, #tpu.memory_space<vmem>>, vector<8x512xf32>
    %cst_81 = arith.constant dense<0.000000e+00> : vector<8x512xf32>
    %212 = tpu.matmul %205, %10, %cst_81 {dimension_numbers = #tpu.dot_dimension_numbers<[1], [0], [0], [1], [0, 0, 1, 1], [], []>} : vector<8x128xf32>, vector<128x512xf32>, vector<8x512xf32> -> vector<8x512xf32>
    %213 = arith.addf %211, %212 : vector<8x512xf32>
    %214 = vector.extract_strided_slice %213 {offsets = [0, 0], sizes = [8, 128], strides = [1, 1]} : vector<8x512xf32> to vector<8x128xf32>
    %cst_82 = arith.constant 5.000000e-01 : f32
    %215 = vector.broadcast %cst_82 : f32 to vector<8x128xf32>
    %216 = arith.mulf %215, %214 : vector<8x128xf32>
    %217 = math.tanh %216 : vector<8x128xf32>
    %cst_83 = arith.constant 5.000000e-01 : f32
    %218 = vector.broadcast %cst_83 : f32 to vector<8x128xf32>
    %219 = arith.mulf %218, %217 : vector<8x128xf32>
    %cst_84 = arith.constant 5.000000e-01 : f32
    %220 = vector.broadcast %cst_84 : f32 to vector<8x128xf32>
    %221 = arith.addf %219, %220 : vector<8x128xf32>
    %222 = vector.extract_strided_slice %213 {offsets = [0, 128], sizes = [8, 128], strides = [1, 1]} : vector<8x512xf32> to vector<8x128xf32>
    %cst_85 = arith.constant 5.000000e-01 : f32
    %223 = vector.broadcast %cst_85 : f32 to vector<8x128xf32>
    %224 = arith.mulf %223, %222 : vector<8x128xf32>
    %225 = math.tanh %224 : vector<8x128xf32>
    %cst_86 = arith.constant 5.000000e-01 : f32
    %226 = vector.broadcast %cst_86 : f32 to vector<8x128xf32>
    %227 = arith.mulf %226, %225 : vector<8x128xf32>
    %cst_87 = arith.constant 5.000000e-01 : f32
    %228 = vector.broadcast %cst_87 : f32 to vector<8x128xf32>
    %229 = arith.addf %227, %228 : vector<8x128xf32>
    %230 = vector.extract_strided_slice %213 {offsets = [0, 256], sizes = [8, 128], strides = [1, 1]} : vector<8x512xf32> to vector<8x128xf32>
    %231 = math.tanh %230 : vector<8x128xf32>
    %232 = vector.extract_strided_slice %213 {offsets = [0, 384], sizes = [8, 128], strides = [1, 1]} : vector<8x512xf32> to vector<8x128xf32>
    %cst_88 = arith.constant 5.000000e-01 : f32
    %233 = vector.broadcast %cst_88 : f32 to vector<8x128xf32>
    %234 = arith.mulf %233, %232 : vector<8x128xf32>
    %235 = math.tanh %234 : vector<8x128xf32>
    %cst_89 = arith.constant 5.000000e-01 : f32
    %236 = vector.broadcast %cst_89 : f32 to vector<8x128xf32>
    %237 = arith.mulf %236, %235 : vector<8x128xf32>
    %cst_90 = arith.constant 5.000000e-01 : f32
    %238 = vector.broadcast %cst_90 : f32 to vector<8x128xf32>
    %239 = arith.addf %237, %238 : vector<8x128xf32>
    %240 = arith.mulf %229, %203 : vector<8x128xf32>
    %241 = arith.mulf %221, %231 : vector<8x128xf32>
    %242 = arith.addf %240, %241 : vector<8x128xf32>
    %243 = math.tanh %242 : vector<8x128xf32>
    %244 = arith.mulf %239, %243 : vector<8x128xf32>
    %245 = arith.index_cast %209 : i32 to index
    %c0_91 = arith.constant 0 : index
    %246 = vector.load %arg11[%245, %c0_91] : memref<64x128xf32, #tpu.memory_space<vmem>>, vector<8x128xf32>
    tpu.vector_store %arg11[%245, %c0_91], %244 {strides = array<i32>} : memref<64x128xf32, #tpu.memory_space<vmem>>, vector<8x128xf32>,
    %c6_i32 = arith.constant 6 : i32
    %c8_i32_92 = arith.constant 8 : i32
    %247 = arith.muli %c6_i32, %c8_i32_92 : i32
    %248 = tpu.assume_multiple %247, 8 : i32
    %249 = arith.index_cast %248 : i32 to index
    %c0_93 = arith.constant 0 : index
    %250 = vector.load %arg10[%249, %c0_93] : memref<64x512xf32, #tpu.memory_space<vmem>>, vector<8x512xf32>
    %cst_94 = arith.constant dense<0.000000e+00> : vector<8x512xf32>
    %251 = tpu.matmul %244, %10, %cst_94 {dimension_numbers = #tpu.dot_dimension_numbers<[1], [0], [0], [1], [0, 0, 1, 1], [], []>} : vector<8x128xf32>, vector<128x512xf32>, vector<8x512xf32> -> vector<8x512xf32>
    %252 = arith.addf %250, %251 : vector<8x512xf32>
    %253 = vector.extract_strided_slice %252 {offsets = [0, 0], sizes = [8, 128], strides = [1, 1]} : vector<8x512xf32> to vector<8x128xf32>
    %cst_95 = arith.constant 5.000000e-01 : f32
    %254 = vector.broadcast %cst_95 : f32 to vector<8x128xf32>
    %255 = arith.mulf %254, %253 : vector<8x128xf32>
    %256 = math.tanh %255 : vector<8x128xf32>
    %cst_96 = arith.constant 5.000000e-01 : f32
    %257 = vector.broadcast %cst_96 : f32 to vector<8x128xf32>
    %258 = arith.mulf %257, %256 : vector<8x128xf32>
    %cst_97 = arith.constant 5.000000e-01 : f32
    %259 = vector.broadcast %cst_97 : f32 to vector<8x128xf32>
    %260 = arith.addf %258, %259 : vector<8x128xf32>
    %261 = vector.extract_strided_slice %252 {offsets = [0, 128], sizes = [8, 128], strides = [1, 1]} : vector<8x512xf32> to vector<8x128xf32>
    %cst_98 = arith.constant 5.000000e-01 : f32
    %262 = vector.broadcast %cst_98 : f32 to vector<8x128xf32>
    %263 = arith.mulf %262, %261 : vector<8x128xf32>
    %264 = math.tanh %263 : vector<8x128xf32>
    %cst_99 = arith.constant 5.000000e-01 : f32
    %265 = vector.broadcast %cst_99 : f32 to vector<8x128xf32>
    %266 = arith.mulf %265, %264 : vector<8x128xf32>
    %cst_100 = arith.constant 5.000000e-01 : f32
    %267 = vector.broadcast %cst_100 : f32 to vector<8x128xf32>
    %268 = arith.addf %266, %267 : vector<8x128xf32>
    %269 = vector.extract_strided_slice %252 {offsets = [0, 256], sizes = [8, 128], strides = [1, 1]} : vector<8x512xf32> to vector<8x128xf32>
    %270 = math.tanh %269 : vector<8x128xf32>
    %271 = vector.extract_strided_slice %252 {offsets = [0, 384], sizes = [8, 128], strides = [1, 1]} : vector<8x512xf32> to vector<8x128xf32>
    %cst_101 = arith.constant 5.000000e-01 : f32
    %272 = vector.broadcast %cst_101 : f32 to vector<8x128xf32>
    %273 = arith.mulf %272, %271 : vector<8x128xf32>
    %274 = math.tanh %273 : vector<8x128xf32>
    %cst_102 = arith.constant 5.000000e-01 : f32
    %275 = vector.broadcast %cst_102 : f32 to vector<8x128xf32>
    %276 = arith.mulf %275, %274 : vector<8x128xf32>
    %cst_103 = arith.constant 5.000000e-01 : f32
    %277 = vector.broadcast %cst_103 : f32 to vector<8x128xf32>
    %278 = arith.addf %276, %277 : vector<8x128xf32>
    %279 = arith.mulf %268, %242 : vector<8x128xf32>
    %280 = arith.mulf %260, %270 : vector<8x128xf32>
    %281 = arith.addf %279, %280 : vector<8x128xf32>
    %282 = math.tanh %281 : vector<8x128xf32>
    %283 = arith.mulf %278, %282 : vector<8x128xf32>
    %284 = arith.index_cast %248 : i32 to index
    %c0_104 = arith.constant 0 : index
    %285 = vector.load %arg11[%284, %c0_104] : memref<64x128xf32, #tpu.memory_space<vmem>>, vector<8x128xf32>
    tpu.vector_store %arg11[%284, %c0_104], %283 {strides = array<i32>} : memref<64x128xf32, #tpu.memory_space<vmem>>, vector<8x128xf32>,
    %c7_i32 = arith.constant 7 : i32
    %c8_i32_105 = arith.constant 8 : i32
    %286 = arith.muli %c7_i32, %c8_i32_105 : i32
    %287 = tpu.assume_multiple %286, 8 : i32
    %288 = arith.index_cast %287 : i32 to index
    %c0_106 = arith.constant 0 : index
    %289 = vector.load %arg10[%288, %c0_106] : memref<64x512xf32, #tpu.memory_space<vmem>>, vector<8x512xf32>
    %cst_107 = arith.constant dense<0.000000e+00> : vector<8x512xf32>
    %290 = tpu.matmul %283, %10, %cst_107 {dimension_numbers = #tpu.dot_dimension_numbers<[1], [0], [0], [1], [0, 0, 1, 1], [], []>} : vector<8x128xf32>, vector<128x512xf32>, vector<8x512xf32> -> vector<8x512xf32>
    %291 = arith.addf %289, %290 : vector<8x512xf32>
    %292 = vector.extract_strided_slice %291 {offsets = [0, 0], sizes = [8, 128], strides = [1, 1]} : vector<8x512xf32> to vector<8x128xf32>
    %cst_108 = arith.constant 5.000000e-01 : f32
    %293 = vector.broadcast %cst_108 : f32 to vector<8x128xf32>
    %294 = arith.mulf %293, %292 : vector<8x128xf32>
    %295 = math.tanh %294 : vector<8x128xf32>
    %cst_109 = arith.constant 5.000000e-01 : f32
    %296 = vector.broadcast %cst_109 : f32 to vector<8x128xf32>
    %297 = arith.mulf %296, %295 : vector<8x128xf32>
    %cst_110 = arith.constant 5.000000e-01 : f32
    %298 = vector.broadcast %cst_110 : f32 to vector<8x128xf32>
    %299 = arith.addf %297, %298 : vector<8x128xf32>
    %300 = vector.extract_strided_slice %291 {offsets = [0, 128], sizes = [8, 128], strides = [1, 1]} : vector<8x512xf32> to vector<8x128xf32>
    %cst_111 = arith.constant 5.000000e-01 : f32
    %301 = vector.broadcast %cst_111 : f32 to vector<8x128xf32>
    %302 = arith.mulf %301, %300 : vector<8x128xf32>
    %303 = math.tanh %302 : vector<8x128xf32>
    %cst_112 = arith.constant 5.000000e-01 : f32
    %304 = vector.broadcast %cst_112 : f32 to vector<8x128xf32>
    %305 = arith.mulf %304, %303 : vector<8x128xf32>
    %cst_113 = arith.constant 5.000000e-01 : f32
    %306 = vector.broadcast %cst_113 : f32 to vector<8x128xf32>
    %307 = arith.addf %305, %306 : vector<8x128xf32>
    %308 = vector.extract_strided_slice %291 {offsets = [0, 256], sizes = [8, 128], strides = [1, 1]} : vector<8x512xf32> to vector<8x128xf32>
    %309 = math.tanh %308 : vector<8x128xf32>
    %310 = vector.extract_strided_slice %291 {offsets = [0, 384], sizes = [8, 128], strides = [1, 1]} : vector<8x512xf32> to vector<8x128xf32>
    %cst_114 = arith.constant 5.000000e-01 : f32
    %311 = vector.broadcast %cst_114 : f32 to vector<8x128xf32>
    %312 = arith.mulf %311, %310 : vector<8x128xf32>
    %313 = math.tanh %312 : vector<8x128xf32>
    %cst_115 = arith.constant 5.000000e-01 : f32
    %314 = vector.broadcast %cst_115 : f32 to vector<8x128xf32>
    %315 = arith.mulf %314, %313 : vector<8x128xf32>
    %cst_116 = arith.constant 5.000000e-01 : f32
    %316 = vector.broadcast %cst_116 : f32 to vector<8x128xf32>
    %317 = arith.addf %315, %316 : vector<8x128xf32>
    %318 = arith.mulf %307, %281 : vector<8x128xf32>
    %319 = arith.mulf %299, %309 : vector<8x128xf32>
    %320 = arith.addf %318, %319 : vector<8x128xf32>
    %321 = math.tanh %320 : vector<8x128xf32>
    %322 = arith.mulf %317, %321 : vector<8x128xf32>
    %323 = arith.index_cast %287 : i32 to index
    %c0_117 = arith.constant 0 : index
    %324 = vector.load %arg11[%323, %c0_117] : memref<64x128xf32, #tpu.memory_space<vmem>>, vector<8x128xf32>
    tpu.vector_store %arg11[%323, %c0_117], %322 {strides = array<i32>} : memref<64x128xf32, #tpu.memory_space<vmem>>, vector<8x128xf32>,
    %c8_i32_118 = arith.constant 8 : i32
    %c0_119 = arith.constant 0 : index
    %c0_120 = arith.constant 0 : index
    %325 = vector.load %arg8[%c0_119, %c0_120] : memref<8x128xf32, #tpu.memory_space<vmem>>, vector<8x128xf32>
    tpu.vector_store %arg8[%c0_119, %c0_120], %322 {strides = array<i32>} : memref<8x128xf32, #tpu.memory_space<vmem>>, vector<8x128xf32>,
    %c0_121 = arith.constant 0 : index
    %c0_122 = arith.constant 0 : index
    %326 = vector.load %arg9[%c0_121, %c0_122] : memref<8x128xf32, #tpu.memory_space<vmem>>, vector<8x128xf32>
    tpu.vector_store %arg9[%c0_121, %c0_122], %320 {strides = array<i32>} : memref<8x128xf32, #tpu.memory_space<vmem>>, vector<8x128xf32>,
    %c0_123 = arith.constant 0 : index
    %c0_124 = arith.constant 0 : index
    %327 = vector.load %arg11[%c0_123, %c0_124] : memref<64x128xf32, #tpu.memory_space<vmem>>, vector<64x128xf32>
    %c0_125 = arith.constant 0 : index
    %c0_126 = arith.constant 0 : index
    %328 = vector.load %arg5[%c0_125, %c0_126] : memref<128x128xf32, #tpu.memory_space<vmem>>, vector<128x128xf32>
    %cst_127 = arith.constant dense<0.000000e+00> : vector<64x128xf32>
    %329 = tpu.matmul %327, %328, %cst_127 {dimension_numbers = #tpu.dot_dimension_numbers<[1], [0], [0], [1], [0, 0, 1, 1], [], []>} : vector<64x128xf32>, vector<128x128xf32>, vector<64x128xf32> -> vector<64x128xf32>
    %c0_128 = arith.constant 0 : index
    %c0_129 = arith.constant 0 : index
    %330 = vector.load %arg6[%c0_128, %c0_129] : memref<1x128xf32, #tpu.memory_space<vmem>>, vector<1x128xf32>
    %331 = vector.broadcast %330 : vector<1x128xf32> to vector<64x128xf32>
    %332 = arith.addf %329, %331 : vector<64x128xf32>
    %333 = math.tanh %332 : vector<64x128xf32>
    %c0_130 = arith.constant 0 : index
    %c0_131 = arith.constant 0 : index
    %334 = vector.load %arg7[%c0_130, %c0_131] : memref<64x128xf32, #tpu.memory_space<vmem>>, vector<64x128xf32>
    tpu.vector_store %arg7[%c0_130, %c0_131], %333 {strides = array<i32>} : memref<64x128xf32, #tpu.memory_space<vmem>>, vector<64x128xf32>,
    return
  }
  func.func @transform_0(%arg0: i32) -> (i32, i32) {
    %c0_i32 = arith.constant 0 : i32
    %c0_i32_0 = arith.constant 0 : i32
    return %arg0, %c0_i32 : i32, i32
  }
  func.func @transform_1(%arg0: i32) -> (i32, i32) {
    %c0_i32 = arith.constant 0 : i32
    %c0_i32_0 = arith.constant 0 : i32
    %c0_i32_1 = arith.constant 0 : i32
    return %c0_i32, %c0_i32_0 : i32, i32
  }
  func.func @transform_2(%arg0: i32) -> (i32, i32) {
    %c0_i32 = arith.constant 0 : i32
    %c0_i32_0 = arith.constant 0 : i32
    %c0_i32_1 = arith.constant 0 : i32
    return %c0_i32, %c0_i32_0 : i32, i32
  }
  func.func @transform_3(%arg0: i32) -> (i32, i32) {
    %c0_i32 = arith.constant 0 : i32
    %c0_i32_0 = arith.constant 0 : i32
    %c0_i32_1 = arith.constant 0 : i32
    return %c0_i32, %c0_i32_0 : i32, i32
  }
  func.func @transform_4(%arg0: i32) -> (i32, i32) {
    %c0_i32 = arith.constant 0 : i32
    %c0_i32_0 = arith.constant 0 : i32
    %c0_i32_1 = arith.constant 0 : i32
    return %c0_i32, %c0_i32_0 : i32, i32
  }
  func.func @transform_5(%arg0: i32) -> (i32, i32) {
    %c0_i32 = arith.constant 0 : i32
    %c0_i32_0 = arith.constant 0 : i32
    %c0_i32_1 = arith.constant 0 : i32
    return %c0_i32, %c0_i32_0 : i32, i32
  }
  func.func @transform_6(%arg0: i32) -> (i32, i32) {
    %c0_i32 = arith.constant 0 : i32
    %c0_i32_0 = arith.constant 0 : i32
    return %arg0, %c0_i32 : i32, i32
  }
}

</mosaic_0001>

<bundles_post_ra>
// kernel: eeg_generator_forward.1
= control target key start
LH: loop header
LB: loop body
LE: loop exit
PB: predicated region body
PF: predicated region fallthrough
CT: control target
= control target key end

     0   :  { %v3922_v3 = vmov 0.0   ;;  %s3915_s1 = inlined_call_operand.vmem [shape: f32[128,512], index: 1, kind: input, shape index: {}]   ;;  %s3916_s2 = inlined_call_operand.vmem [shape: f32[128,512], index: 2, kind: input, shape index: {}]   ;;  %s3917_s0 = inlined_call_operand.vmem [shape: f32[64,128], index: 0, kind: input, shape index: {}]   ;;  %s3918_s3 = inlined_call_operand.vmem [shape: f32[1,512], index: 3, kind: input, shape index: {}]   ;;  %s3919_s4 = inlined_call_operand.vmem [shape: f32[128,128], index: 4, kind: input, shape index: {}]   ;;  %s3920_s5 = inlined_call_operand.vmem [shape: f32[1,128], index: 5, kind: input, shape index: {}]   ;;  %s3921_s6 = inlined_call_operand.vmem [shape: f32[64,128], index: 6, kind: output, shape index: {}]  }
   0x1   :  { %v98_v0 = vld [vmem:[%s3915_s1 + $0x1e8] sm:$0xff]  ;;  %v97_v1 = vld [vmem:[%s3915_s1 + $0x1e0] sm:$0xff]  ;;  %187 = vmatprep.mubr.f32.mxu1 %v3922_v3  ;;  %518 = vmatprep.mubr.f32.mxu0 %v3922_v3 }
   0x2   :  { %v94_v2 = vld [vmem:[%s3915_s1 + $0x1c8] sm:$0xff]  ;;  %123 = vmatprep.subr.mxu1 %v98_v0  ;;  %v93_v5 = vld [vmem:[%s3915_s1 + $0x1c0] sm:$0xff] }
   0x3   :  { %v2275_v4 = vld [vmem:[%s3916_s2 + $0x1e8] sm:$0xff]  ;;  %v2283_v6 = vld [vmem:[%s3916_s2 + $0x1e0] sm:$0xff]  ;;  %124 = vmatpush1.msra.mxu1 %v97_v1  ;;  %v100_v1 = vld [vmem:[%s3915_s1 + $0x1f8] sm:$0xff] }
   0x4   :  { %454 = vmatprep.subr.mxu0 %v2275_v4  ;;  %v90_v7 = vld [vmem:[%s3915_s1 + $0x1a8] sm:$0xff]  ;;  %125 = vmatprep.subr.mxu1 %v94_v2  ;;  %v89_v9 = vld [vmem:[%s3915_s1 + $0x1a0] sm:$0xff]  ;;  %v99_v2 = vld [vmem:[%s3915_s1 + $0x1f0] sm:$0xff] }
   0x5   :  { %v2292_v8 = vld [vmem:[%s3916_s2 + $0x1c8] sm:$0xff]  ;;  %455 = vmatpush1.msra.mxu0 %v2283_v6  ;;  %v2301_v10 = vld [vmem:[%s3916_s2 + $0x1c0] sm:$0xff]  ;;  %126 = vmatpush1.msra.mxu1 %v93_v5 }
   0x6   :  { %v2306_v11 = vld [vmem:[%s3916_s2 + $0x1a8] sm:$0xff]  ;;  %456 = vmatprep.subr.mxu0 %v2292_v8  ;;  %v2315_v13 = vld [vmem:[%s3916_s2 + $0x1a0] sm:$0xff]  ;;  %127 = vmatprep.subr.mxu1 %v90_v7  ;;  %v96_v7 = vld [vmem:[%s3915_s1 + $0x1d8] sm:$0xff] }
   0x7   :  { %v86_v12 = vld [vmem:[%s3915_s1 + $0x188] sm:$0xff]  ;;  %457 = vmatpush1.msra.mxu0 %v2301_v10  ;;  %v85_v14 = vld [vmem:[%s3915_s1 + $0x180] sm:$0xff]  ;;  %128 = vmatpush1.msra.mxu1 %v89_v9  ;;  %v95_v9 = vld [vmem:[%s3915_s1 + $0x1d0] sm:$0xff] }
   0x8   :  { %v2324_v15 = vld [vmem:[%s3916_s2 + $0x188] sm:$0xff]  ;;  %458 = vmatprep.subr.mxu0 %v2306_v11  ;;  %v2333_v17 = vld [vmem:[%s3916_s2 + $0x180] sm:$0xff]  ;;  %129 = vmatprep.subr.mxu1 %v86_v12 }
   0x9   :  { %v82_v16 = vld [vmem:[%s3915_s1 + $0x168] sm:$0xff]  ;;  %459 = vmatpush1.msra.mxu0 %v2315_v13  ;;  %v81_v18 = vld [vmem:[%s3915_s1 + $0x160] sm:$0xff]  ;;  %130 = vmatpush1.msra.mxu1 %v85_v14  ;;  %v92_v14 = vld [vmem:[%s3915_s1 + $0x1b8] sm:$0xff] }
   0xa   :  { %v2342_v19 = vld [vmem:[%s3916_s2 + $0x168] sm:$0xff]  ;;  %460 = vmatprep.subr.mxu0 %v2324_v15  ;;  %v2351_v21 = vld [vmem:[%s3916_s2 + $0x160] sm:$0xff]  ;;  %131 = vmatprep.subr.mxu1 %v82_v16  ;;  %v91_v16 = vld [vmem:[%s3915_s1 + $0x1b0] sm:$0xff] }
   0xb   :  { %v78_v20 = vld [vmem:[%s3915_s1 + $0x148] sm:$0xff]  ;;  %461 = vmatpush1.msra.mxu0 %v2333_v17  ;;  %v77_v22 = vld [vmem:[%s3915_s1 + $0x140] sm:$0xff]  ;;  %132 = vmatpush1.msra.mxu1 %v81_v18  ;;  %v88_v18 = vld [vmem:[%s3915_s1 + $0x198] sm:$0xff] }
   0xc   :  { %v2360_v23 = vld [vmem:[%s3916_s2 + $0x148] sm:$0xff]  ;;  %462 = vmatprep.subr.mxu0 %v2342_v19  ;;  %v2369_v25 = vld [vmem:[%s3916_s2 + $0x140] sm:$0xff]  ;;  %133 = vmatprep.subr.mxu1 %v78_v20  ;;  %v87_v20 = vld [vmem:[%s3915_s1 + $0x190] sm:$0xff] }
   0xd   :  { %v74_v24 = vld [vmem:[%s3915_s1 + $0x128] sm:$0xff]  ;;  %463 = vmatpush1.msra.mxu0 %v2351_v21  ;;  %v73_v26 = vld [vmem:[%s3915_s1 + $0x120] sm:$0xff]  ;;  %134 = vmatpush1.msra.mxu1 %v77_v22  ;;  %v2593_v22 = vld [vmem:[%s3917_s0 + $0x10] sm:$0xff] }
   0xe   :  { %v2378_v27 = vld [vmem:[%s3916_s2 + $0x128] sm:$0xff]  ;;  %464 = vmatprep.subr.mxu0 %v2360_v23  ;;  %v2387_v29 = vld [vmem:[%s3916_s2 + $0x120] sm:$0xff]  ;;  %135 = vmatprep.subr.mxu1 %v74_v24  ;;  %v84_v24 = vld [vmem:[%s3915_s1 + $0x178] sm:$0xff] }
   0xf   :  { %v70_v28 = vld [vmem:[%s3915_s1 + $0x108] sm:$0xff]  ;;  %465 = vmatpush1.msra.mxu0 %v2369_v25  ;;  %v69_v30 = vld [vmem:[%s3915_s1 + $0x100] sm:$0xff]  ;;  %136 = vmatpush1.msra.mxu1 %v73_v26  ;;  %v83_v26 = vld [vmem:[%s3915_s1 + $0x170] sm:$0xff] }
  0x10   :  { %v2396_v31 = vld [vmem:[%s3916_s2 + $0x108] sm:$0xff]  ;;  %466 = vmatprep.subr.mxu0 %v2378_v27  ;;  %v2405_v33 = vld [vmem:[%s3916_s2 + $0x100] sm:$0xff]  ;;  %137 = vmatprep.subr.mxu1 %v70_v28  ;;  %v80_v28 = vld [vmem:[%s3915_s1 + $0x158] sm:$0xff] }
  0x11   :  { %v66_v32 = vld [vmem:[%s3915_s1 + $0xe8] sm:$0xff]  ;;  %467 = vmatpush1.msra.mxu0 %v2387_v29  ;;  %v65_v34 = vld [vmem:[%s3915_s1 + $0xe0] sm:$0xff]  ;;  %138 = vmatpush1.msra.mxu1 %v69_v30  ;;  %v79_v30 = vld [vmem:[%s3915_s1 + $0x150] sm:$0xff] }
  0x12   :  { %v2414_v35 = vld [vmem:[%s3916_s2 + $0xe8] sm:$0xff]  ;;  %468 = vmatprep.subr.mxu0 %v2396_v31  ;;  %v2423_v37 = vld [vmem:[%s3916_s2 + $0xe0] sm:$0xff]  ;;  %139 = vmatprep.subr.mxu1 %v66_v32  ;;  %v2614_v32 = vld [vmem:[%s3917_s0 + $0x18] sm:$0xff] }
  0x13   :  { %v62_v36 = vld [vmem:[%s3915_s1 + $0xc8] sm:$0xff]  ;;  %469 = vmatpush1.msra.mxu0 %v2405_v33  ;;  %v61_v38 = vld [vmem:[%s3915_s1 + $0xc0] sm:$0xff]  ;;  %140 = vmatpush1.msra.mxu1 %v65_v34  ;;  %v76_v34 = vld [vmem:[%s3915_s1 + $0x138] sm:$0xff] }
  0x14   :  { %v2432_v39 = vld [vmem:[%s3916_s2 + $0xc8] sm:$0xff]  ;;  %470 = vmatprep.subr.mxu0 %v2414_v35  ;;  %v2441_v41 = vld [vmem:[%s3916_s2 + $0xc0] sm:$0xff]  ;;  %141 = vmatprep.subr.mxu1 %v62_v36  ;;  %v75_v36 = vld [vmem:[%s3915_s1 + $0x130] sm:$0xff] }
  0x15   :  { %v58_v40 = vld [vmem:[%s3915_s1 + $0xa8] sm:$0xff]  ;;  %471 = vmatpush1.msra.mxu0 %v2423_v37  ;;  %v57_v42 = vld [vmem:[%s3915_s1 + $0xa0] sm:$0xff]  ;;  %142 = vmatpush1.msra.mxu1 %v61_v38  ;;  %v72_v38 = vld [vmem:[%s3915_s1 + $0x118] sm:$0xff] }
  0x16   :  { %v2450_v43 = vld [vmem:[%s3916_s2 + $0xa8] sm:$0xff]  ;;  %472 = vmatprep.subr.mxu0 %v2432_v39  ;;  %v2459_v45 = vld [vmem:[%s3916_s2 + $0xa0] sm:$0xff]  ;;  %143 = vmatprep.subr.mxu1 %v58_v40  ;;  %v71_v40 = vld [vmem:[%s3915_s1 + $0x110] sm:$0xff] }
  0x17   :  { %v54_v44 = vld [vmem:[%s3915_s1 + $0x88] sm:$0xff]  ;;  %4032 = vst [vmem:[#allocation6_spill] sm:$0xff] %v2459_v45  ;;  %473 = vmatpush1.msra.mxu0 %v2441_v41  ;;  %v53_v46 = vld [vmem:[%s3915_s1 + $0x80] sm:$0xff]  ;;  %144 = vmatpush1.msra.mxu1 %v57_v42 }
  0x18   :  { %v2468_v47 = vld [vmem:[%s3916_s2 + $0x88] sm:$0xff]  ;;  %474 = vmatprep.subr.mxu0 %v2450_v43  ;;  %v2477_v49 = vld [vmem:[%s3916_s2 + $0x80] sm:$0xff]  ;;  %145 = vmatprep.subr.mxu1 %v54_v44  ;;  %v68_v44 = vld [vmem:[%s3915_s1 + $0xf8] sm:$0xff] }
  0x19   :  { %4033 = vst [vmem:[#allocation7_spill] sm:$0xff] %v2468_v47  ;;  %v50_v48 = vld [vmem:[%s3915_s1 + $0x68] sm:$0xff]  ;;  %4034 = vst [vmem:[#allocation8_spill] sm:$0xff] %v2477_v49  ;;  %475 = vmatpush1.msra.mxu0 %v2459_v45  ;;  %v49_v50 = vld [vmem:[%s3915_s1 + $0x60] sm:$0xff]  ;;  %146 = vmatpush1.msra.mxu1 %v53_v46 }
  0x1a   :  { %v2486_v51 = vld [vmem:[%s3916_s2 + $0x68] sm:$0xff]  ;;  %476 = vmatprep.subr.mxu0 %v2468_v47  ;;  %v2495_v53 = vld [vmem:[%s3916_s2 + $0x60] sm:$0xff]  ;;  %147 = vmatprep.subr.mxu1 %v50_v48  ;;  %v67_v46 = vld [vmem:[%s3915_s1 + $0xf0] sm:$0xff] }
  0x1b   :  { %4035 = vst [vmem:[#allocation9_spill] sm:$0xff] %v2486_v51  ;;  %v46_v52 = vld [vmem:[%s3915_s1 + $0x48] sm:$0xff]  ;;  %4036 = vst [vmem:[#allocation10_spill] sm:$0xff] %v2495_v53  ;;  %477 = vmatpush1.msra.mxu0 %v2477_v49  ;;  %v45_v54 = vld [vmem:[%s3915_s1 + $0x40] sm:$0xff]  ;;  %148 = vmatpush1.msra.mxu1 %v49_v50 }
  0x1c   :  { %v2504_v55 = vld [vmem:[%s3916_s2 + $0x48] sm:$0xff]  ;;  %478 = vmatprep.subr.mxu0 %v2486_v51  ;;  %v2513_v57 = vld [vmem:[%s3916_s2 + $0x40] sm:$0xff]  ;;  %149 = vmatprep.subr.mxu1 %v46_v52  ;;  %v64_v48 = vld [vmem:[%s3915_s1 + $0xd8] sm:$0xff] }
  0x1d   :  { %4037 = vst [vmem:[#allocation11_spill] sm:$0xff] %v2504_v55  ;;  %v42_v56 = vld [vmem:[%s3915_s1 + $0x28] sm:$0xff]  ;;  %4038 = vst [vmem:[#allocation12_spill] sm:$0xff] %v2513_v57  ;;  %479 = vmatpush1.msra.mxu0 %v2495_v53  ;;  %v41_v58 = vld [vmem:[%s3915_s1 + $0x20] sm:$0xff]  ;;  %150 = vmatpush1.msra.mxu1 %v45_v54 }
  0x1e   :  { %v2522_v59 = vld [vmem:[%s3916_s2 + $0x28] sm:$0xff]  ;;  %480 = vmatprep.subr.mxu0 %v2504_v55  ;;  %v2531_v61 = vld [vmem:[%s3916_s2 + $0x20] sm:$0xff]  ;;  %151 = vmatprep.subr.mxu1 %v42_v56  ;;  %v63_v50 = vld [vmem:[%s3915_s1 + $0xd0] sm:$0xff] }
  0x1f   :  { %4039 = vst [vmem:[#allocation13_spill] sm:$0xff] %v2522_v59  ;;  %v38_v60 = vld [vmem:[%s3915_s1 + $0x8] sm:$0xff]  ;;  %4040 = vst [vmem:[#allocation14_spill] sm:$0xff] %v2531_v61  ;;  %481 = vmatpush1.msra.mxu0 %v2513_v57  ;;  %v37_v62 = vld [vmem:[%s3915_s1] sm:$0xff]  ;;  %152 = vmatpush1.msra.mxu1 %v41_v58 }
  0x20   :  { %v2540_v63 = vld [vmem:[%s3916_s2 + $0x8] sm:$0xff]  ;;  %482 = vmatprep.subr.mxu0 %v2522_v59  ;;  %v2546_v0 = vld [vmem:[%s3917_s0] sm:$0xff]  ;;  %153 = vmatprep.subr.mxu1 %v38_v60  ;;  %v60_v54 = vld [vmem:[%s3915_s1 + $0xb8] sm:$0xff] }
  0x21   :  { %4041 = vst [vmem:[#allocation15_spill] sm:$0xff] %v2540_v63  ;;  %483 = vmatpush1.msra.mxu0 %v2531_v61  ;;  %v2558_v5 = vld [vmem:[%s3916_s2] sm:$0xff]  ;;  %154 = vmatpush1.msra.mxu1 %v37_v62  ;;  %v2572_v12 = vld [vmem:[%s3917_s0 + $0x8] sm:$0xff]  ;;  %v59_v56 = vld [vmem:[%s3915_s1 + $0xb0] sm:$0xff] }
  0x22   :  { %4042 = vst [vmem:[#allocation16_spill] sm:$0xff] %v2558_v5  ;;  %484 = vmatprep.subr.mxu0 %v2540_v63  ;;  %188 = vmatmul.mubr.f32.vlgmr.msra.gmra.mxu1 %v2546_v0  ;;  %v2635_v42 = vld [vmem:[%s3917_s0 + $0x20] sm:$0xff]  ;;  %v2656_v52 = vld [vmem:[%s3917_s0 + $0x28] sm:$0xff]  ;;  %v56_v58 = vld [vmem:[%s3915_s1 + $0x98] sm:$0xff] }
  0x23   :  { %236 = vmatprep.subr.mxu1 %v100_v1  ;;  %485 = vmatpush1.msra.mxu0 %v2558_v5  ;;  %v55_v60 = vld [vmem:[%s3915_s1 + $0x90] sm:$0xff]  ;;  %v52_v1 = vld [vmem:[%s3915_s1 + $0x78] sm:$0xff] }
  0x24   :  { %237 = vmatpush1.msra.mxu1 %v99_v2  ;;  %519 = vmatmul.mubr.f32.vlgmr.msra.gmra.mxu0 %v3922_v3  ;;  %v2677_v62 = vld [vmem:[%s3917_s0 + $0x30] sm:$0xff] }
  0x25   :  { %238 = vmatprep.subr.mxu1 %v96_v7  ;;  %193 = vmatprep.mubr.f32.mxu1 %v3922_v3  ;;  %v51_v2 = vld [vmem:[%s3915_s1 + $0x70] sm:$0xff]  ;;  %v48_v7 = vld [vmem:[%s3915_s1 + $0x58] sm:$0xff] }
  0x26   :  { %239 = vmatpush1.msra.mxu1 %v95_v9  ;;  %626 = vmatprep.subr.mxu0 %v2275_v4  ;;  %v47_v9 = vld [vmem:[%s3915_s1 + $0x50] sm:$0xff] }
  0x27   :  { %194 = vmatmul.mubr.f32.gmra.mxu1 %v2572_v12  ;;  %240 = vmatprep.subr.mxu1 %v92_v14  ;;  %v2698_v14 = vld [vmem:[%s3917_s0 + $0x38] sm:$0xff] }
  0x28   :  { %241 = vmatpush1.msra.mxu1 %v91_v16  ;;  %199 = vmatprep.mubr.f32.mxu1 %v3922_v3  ;;  %v44_v16 = vld [vmem:[%s3915_s1 + $0x38] sm:$0xff] }
  0x29   :  { %242 = vmatprep.subr.mxu1 %v88_v18  ;;  %627 = vmatpush1.msra.mxu0 %v2283_v6  ;;  %v43_v18 = vld [vmem:[%s3915_s1 + $0x30] sm:$0xff] }
  0x2a   :  { %243 = vmatpush1.msra.mxu1 %v87_v20  ;;  %628 = vmatprep.subr.mxu0 %v2292_v8  ;;  %v40_v20 = vld [vmem:[%s3915_s1 + $0x18] sm:$0xff] }
  0x2b   :  { %200 = vmatmul.mubr.f32.gmra.mxu1 %v2593_v22  ;;  %244 = vmatprep.subr.mxu1 %v84_v24  ;;  %v39_v24 = vld [vmem:[%s3915_s1 + $0x10] sm:$0xff] }
  0x2c   :  { %245 = vmatpush1.msra.mxu1 %v83_v26  ;;  %205 = vmatprep.mubr.f32.mxu1 %v3922_v3  ;;  %v2719_v26 = vld [vmem:[%s3916_s2 + $0x1f8] sm:$0xff] }
  0x2d   :  { %246 = vmatprep.subr.mxu1 %v80_v28  ;;  %629 = vmatpush1.msra.mxu0 %v2301_v10  ;;  %4043 = vst [vmem:[#allocation17_spill] sm:$0xff] %v2719_v26  ;;  %v2724_v28 = vld [vmem:[%s3916_s2 + $0x1f0] sm:$0xff] }
  0x2e   :  { %247 = vmatpush1.msra.mxu1 %v79_v30  ;;  %630 = vmatprep.subr.mxu0 %v2306_v11  ;;  %v2730_v30 = vld [vmem:[%s3916_s2 + $0x1d8] sm:$0xff] }
  0x2f   :  { %206 = vmatmul.mubr.f32.gmra.mxu1 %v2614_v32  ;;  %248 = vmatprep.subr.mxu1 %v76_v34  ;;  %v2738_v34 = vld [vmem:[%s3916_s2 + $0x1d0] sm:$0xff] }
  0x30   :  { %249 = vmatpush1.msra.mxu1 %v75_v36  ;;  %211 = vmatprep.mubr.f32.mxu1 %v3922_v3  ;;  %v2745_v36 = vld [vmem:[%s3916_s2 + $0x1b8] sm:$0xff] }
  0x31   :  { %250 = vmatprep.subr.mxu1 %v72_v38  ;;  %631 = vmatpush1.msra.mxu0 %v2315_v13  ;;  %v2758_v38 = vld [vmem:[%s3916_s2 + $0x198] sm:$0xff] }
  0x32   :  { %251 = vmatpush1.msra.mxu1 %v71_v40  ;;  %632 = vmatprep.subr.mxu0 %v2324_v15  ;;  %v2766_v40 = vld [vmem:[%s3916_s2 + $0x190] sm:$0xff] }
  0x33   :  { %212 = vmatmul.mubr.f32.gmra.mxu1 %v2635_v42  ;;  %252 = vmatprep.subr.mxu1 %v68_v44  ;;  %v2773_v44 = vld [vmem:[%s3916_s2 + $0x178] sm:$0xff] }
  0x34   :  { %253 = vmatpush1.msra.mxu1 %v67_v46  ;;  %217 = vmatprep.mubr.f32.mxu1 %v3922_v3  ;;  %v2786_v46 = vld [vmem:[%s3916_s2 + $0x158] sm:$0xff] }
  0x35   :  { %254 = vmatprep.subr.mxu1 %v64_v48  ;;  %633 = vmatpush1.msra.mxu0 %v2333_v17  ;;  %v2794_v48 = vld [vmem:[%s3916_s2 + $0x150] sm:$0xff] }
  0x36   :  { %255 = vmatpush1.msra.mxu1 %v63_v50  ;;  %634 = vmatprep.subr.mxu0 %v2342_v19  ;;  %v2801_v50 = vld [vmem:[%s3916_s2 + $0x138] sm:$0xff] }
  0x37   :  { %218 = vmatmul.mubr.f32.gmra.mxu1 %v2656_v52  ;;  %256 = vmatprep.subr.mxu1 %v60_v54  ;;  %v2814_v54 = vld [vmem:[%s3916_s2 + $0x118] sm:$0xff] }
  0x38   :  { %257 = vmatpush1.msra.mxu1 %v59_v56  ;;  %223 = vmatprep.mubr.f32.mxu1 %v3922_v3  ;;  %v2822_v56 = vld [vmem:[%s3916_s2 + $0x110] sm:$0xff] }
  0x39   :  { %258 = vmatprep.subr.mxu1 %v56_v58  ;;  %635 = vmatpush1.msra.mxu0 %v2351_v21  ;;  %v2829_v58 = vld [vmem:[%s3916_s2 + $0xf8] sm:$0xff] }
  0x3a   :  { %259 = vmatpush1.msra.mxu1 %v55_v60  ;;  %636 = vmatprep.subr.mxu0 %v2360_v23  ;;  %v2842_v60 = vld [vmem:[%s3916_s2 + $0xd8] sm:$0xff] }
  0x3b   :  { %224 = vmatmul.mubr.f32.gmra.mxu1 %v2677_v62  ;;  %260 = vmatprep.subr.mxu1 %v52_v1  ;;  %v2850_v1 = vld [vmem:[%s3916_s2 + $0xd0] sm:$0xff] }
  0x3c   :  { %261 = vmatpush1.msra.mxu1 %v51_v2  ;;  %229 = vmatprep.mubr.f32.mxu1 %v3922_v3  ;;  %v2857_v2 = vld [vmem:[%s3916_s2 + $0xb8] sm:$0xff] }
  0x3d   :  { %262 = vmatprep.subr.mxu1 %v48_v7  ;;  %637 = vmatpush1.msra.mxu0 %v2369_v25  ;;  %4044 = vst [vmem:[#allocation18_spill] sm:$0xff] %v2857_v2  ;;  %v2870_v7 = vld [vmem:[%s3916_s2 + $0x98] sm:$0xff] }
  0x3e   :  { %263 = vmatpush1.msra.mxu1 %v47_v9  ;;  %638 = vmatprep.subr.mxu0 %v2378_v27  ;;  %4046 = vst [vmem:[#allocation20_spill] sm:$0xff] %v2870_v7  ;;  %v2878_v9 = vld [vmem:[%s3916_s2 + $0x90] sm:$0xff] }
  0x3f   :  { %230 = vmatmul.mubr.f32.gmra.mxu1 %v2698_v14  ;;  %264 = vmatprep.subr.mxu1 %v44_v16  ;;  %4047 = vst [vmem:[#allocation21_spill] sm:$0xff] %v2878_v9  ;;  %v2885_v16 = vld [vmem:[%s3916_s2 + $0x78] sm:$0xff] }
  0x40   :  { %265 = vmatpush1.msra.mxu1 %v43_v18  ;;  %300 = vmatprep.mubr.f32.mxu1 %v3922_v3  ;;  %4048 = vst [vmem:[#allocation22_spill] sm:$0xff] %v2885_v16  ;;  %v2898_v18 = vld [vmem:[%s3916_s2 + $0x58] sm:$0xff] }
  0x41   :  { %266 = vmatprep.subr.mxu1 %v40_v20  ;;  %639 = vmatpush1.msra.mxu0 %v2387_v29  ;;  %4050 = vst [vmem:[#allocation24_spill] sm:$0xff] %v2898_v18  ;;  %v2906_v20 = vld [vmem:[%s3916_s2 + $0x50] sm:$0xff] }
  0x42   :  { %267 = vmatpush1.msra.mxu1 %v39_v24  ;;  %640 = vmatprep.subr.mxu0 %v2396_v31  ;;  %4051 = vst [vmem:[#allocation25_spill] sm:$0xff] %v2906_v20  ;;  %v2913_v24 = vld [vmem:[%s3916_s2 + $0x38] sm:$0xff] }
  0x43   :  { %301 = vmatmul.mubr.f32.vlgmr.msra.gmra.mxu1 %v2546_v0  ;;  %525 = vmatprep.subr.mxu1 %v2719_v26  ;;  %v2751_v0 = vld [vmem:[%s3916_s2 + $0x1b0] sm:$0xff]  ;;  %4052 = vst [vmem:[#allocation26_spill] sm:$0xff] %v2913_v24 }
  0x44   :  { %526 = vmatpush1.msra.mxu1 %v2724_v28  ;;  %306 = vmatprep.mubr.f32.mxu1 %v3922_v3 }
  0x45   :  { %527 = vmatprep.subr.mxu1 %v2730_v30  ;;  %641 = vmatpush1.msra.mxu0 %v2405_v33 }
  0x46   :  { %528 = vmatpush1.msra.mxu1 %v2738_v34  ;;  %642 = vmatprep.subr.mxu0 %v2414_v35 }
  0x47   :  { %307 = vmatmul.mubr.f32.gmra.mxu1 %v2572_v12  ;;  %529 = vmatprep.subr.mxu1 %v2745_v36  ;;  %v2779_v12 = vld [vmem:[%s3916_s2 + $0x170] sm:$0xff] }
  0x48   :  { %530 = vmatpush1.msra.mxu1 %v2751_v0  ;;  %312 = vmatprep.mubr.f32.mxu1 %v3922_v3 }
  0x49   :  { %531 = vmatprep.subr.mxu1 %v2758_v38  ;;  %643 = vmatpush1.msra.mxu0 %v2423_v37 }
  0x4a   :  { %532 = vmatpush1.msra.mxu1 %v2766_v40  ;;  %644 = vmatprep.subr.mxu0 %v2432_v39 }
  0x4b   :  { %313 = vmatmul.mubr.f32.gmra.mxu1 %v2593_v22  ;;  %533 = vmatprep.subr.mxu1 %v2773_v44  ;;  %v2807_v22 = vld [vmem:[%s3916_s2 + $0x130] sm:$0xff] }
  0x4c   :  { %534 = vmatpush1.msra.mxu1 %v2779_v12  ;;  %318 = vmatprep.mubr.f32.mxu1 %v3922_v3 }
  0x4d   :  { %535 = vmatprep.subr.mxu1 %v2786_v46  ;;  %645 = vmatpush1.msra.mxu0 %v2441_v41 }
  0x4e   :  { %536 = vmatpush1.msra.mxu1 %v2794_v48  ;;  %646 = vmatprep.subr.mxu0 %v2450_v43 }
  0x4f   :  { %319 = vmatmul.mubr.f32.gmra.mxu1 %v2614_v32  ;;  %537 = vmatprep.subr.mxu1 %v2801_v50  ;;  %v2835_v32 = vld [vmem:[%s3916_s2 + $0xf0] sm:$0xff] }
  0x50   :  { %538 = vmatpush1.msra.mxu1 %v2807_v22  ;;  %324 = vmatprep.mubr.f32.mxu1 %v3922_v3 }
  0x51   :  { %539 = vmatprep.subr.mxu1 %v2814_v54  ;;  %647 = vmatpush1.msra.mxu0 %v2459_v45 }
  0x52   :  { %540 = vmatpush1.msra.mxu1 %v2822_v56  ;;  %648 = vmatprep.subr.mxu0 %v2468_v47 }
  0x53   :  { %325 = vmatmul.mubr.f32.gmra.mxu1 %v2635_v42  ;;  %541 = vmatprep.subr.mxu1 %v2829_v58  ;;  %v2863_v42 = vld [vmem:[%s3916_s2 + $0xb0] sm:$0xff] }
  0x54   :  { %542 = vmatpush1.msra.mxu1 %v2835_v32  ;;  %330 = vmatprep.mubr.f32.mxu1 %v3922_v3  ;;  %4045 = vst [vmem:[#allocation19_spill] sm:$0xff] %v2863_v42 }
  0x55   :  { %543 = vmatprep.subr.mxu1 %v2842_v60  ;;  %649 = vmatpush1.msra.mxu0 %v2477_v49 }
  0x56   :  { %544 = vmatpush1.msra.mxu1 %v2850_v1  ;;  %650 = vmatprep.subr.mxu0 %v2486_v51 }
  0x57   :  { %331 = vmatmul.mubr.f32.gmra.mxu1 %v2656_v52  ;;  %545 = vmatprep.subr.mxu1 %v2857_v2  ;;  %v2891_v52 = vld [vmem:[%s3916_s2 + $0x70] sm:$0xff] }
  0x58   :  { %546 = vmatpush1.msra.mxu1 %v2863_v42  ;;  %336 = vmatprep.mubr.f32.mxu1 %v3922_v3  ;;  %4049 = vst [vmem:[#allocation23_spill] sm:$0xff] %v2891_v52 }
  0x59   :  { %547 = vmatprep.subr.mxu1 %v2870_v7  ;;  %651 = vmatpush1.msra.mxu0 %v2495_v53  ;;  %v2934_v53 = vld [vmem:[%s3916_s2 + $0x10] sm:$0xff] }
  0x5a   :  { %548 = vmatpush1.msra.mxu1 %v2878_v9  ;;  %652 = vmatprep.subr.mxu0 %v2504_v55  ;;  %4055 = vst [vmem:[#allocation29_spill] sm:$0xff] %v2934_v53  ;;  %v4056_v55 = vmov 0.0  }
  0x5b   :  { %337 = vmatmul.mubr.f32.gmra.mxu1 %v2677_v62  ;;  %549 = vmatprep.subr.mxu1 %v2885_v16  ;;  %v2919_v62 = vld [vmem:[%s3916_s2 + $0x30] sm:$0xff] }
  0x5c   :  { %550 = vmatpush1.msra.mxu1 %v2891_v52  ;;  %342 = vmatprep.mubr.f32.mxu1 %v3922_v3  ;;  %4053 = vst [vmem:[#allocation27_spill] sm:$0xff] %v2919_v62  ;;  %v2926_v3 = vld [vmem:[%s3916_s2 + $0x18] sm:$0xff] }
  0x5d   :  { %551 = vmatprep.subr.mxu1 %v2898_v18  ;;  %4054 = vst [vmem:[#allocation28_spill] sm:$0xff] %v2926_v3  ;;  %653 = vmatpush1.msra.mxu0 %v2513_v57 }
  0x5e   :  { %552 = vmatpush1.msra.mxu1 %v2906_v20  ;;  %654 = vmatprep.subr.mxu0 %v2522_v59 }
  0x5f   :  { %343 = vmatmul.mubr.f32.gmra.mxu1 %v2698_v14  ;;  %553 = vmatprep.subr.mxu1 %v2913_v24 }
  0x60   :  { %554 = vmatpush1.msra.mxu1 %v2919_v62  ;;  %589 = vmatprep.mubr.f32.mxu1 %v4056_v55 }
  0x61   :  { %555 = vmatprep.subr.mxu1 %v2926_v3  ;;  %655 = vmatpush1.msra.mxu0 %v2531_v61 }
  0x62   :  { %556 = vmatpush1.msra.mxu1 %v2934_v53  ;;  %656 = vmatprep.subr.mxu0 %v2540_v63 }
  0x63   :  { %590 = vmatmul.mubr.f32.vlgmr.msra.gmra.mxu1 %v4056_v55  ;;  %697 = vmatprep.subr.mxu1 %v2719_v26 }
  0x64   :  { %698 = vmatpush1.msra.mxu1 %v2724_v28  ;;  %657 = vmatpush1.msra.mxu0 %v2558_v5  ;;  %v101_v5 = vld [vmem:[%s3918_s3] sm:$0xf] }
  0x65   :  { %699 = vmatprep.subr.mxu1 %v2730_v30  ;;  %690 = vmatprep.mubr.f32.mxu0 %v4056_v55 }
  0x66   :  { %700 = vmatpush1.msra.mxu1 %v2738_v34  ;;  %761 = vmatprep.mubr.f32.mxu1 %v4056_v55 }
  0x67   :  { %701 = vmatprep.subr.mxu1 %v2745_v36  ;;  %799 = vmatprep.subr.mxu0 %v2275_v4  ;;  %v103_v4 = vlaneseq }
  0x68   :  { %702 = vmatpush1.msra.mxu1 %v2751_v0 }
  0x69   :  { %703 = vmatprep.subr.mxu1 %v2758_v38  ;;  %v104_v14 = vshrl.u32 %v103_v4, 7 }
  0x6a   :  { %704 = vmatpush1.msra.mxu1 %v2766_v40 }
  0x6b   :  { %705 = vmatprep.subr.mxu1 %v2773_v44  ;;  %v105_v55 = vsub.s32 0, %v104_v14  ;;  %v109_v61 = vsub.s32 1, %v104_v14 }
  0x6c   :  { %706 = vmatpush1.msra.mxu1 %v2779_v12 }
  0x6d   :  { %707 = vmatprep.subr.mxu1 %v2786_v46  ;;  %v110_v57 = vrot.slane %v101_v5, %v109_v61 }
  0x6e   :  { %708 = vmatpush1.msra.mxu1 %v2794_v48 }
  0x6f   :  { %709 = vmatprep.subr.mxu1 %v2801_v50 }
  0x70   :  { %710 = vmatpush1.msra.mxu1 %v2807_v22 }
  0x71   :  { %711 = vmatprep.subr.mxu1 %v2814_v54 }
  0x72   :  { %712 = vmatpush1.msra.mxu1 %v2822_v56 }
  0x73   :  { %713 = vmatprep.subr.mxu1 %v2829_v58 }
  0x74   :  { %714 = vmatpush1.msra.mxu1 %v2835_v32 }
  0x75   :  { %715 = vmatprep.subr.mxu1 %v2842_v60 }
  0x76   :  { %716 = vmatpush1.msra.mxu1 %v2850_v1 }
  0x77   :  { %717 = vmatprep.subr.mxu1 %v2857_v2 }
  0x78   :  { %718 = vmatpush1.msra.mxu1 %v2863_v42 }
  0x79   :  { %719 = vmatprep.subr.mxu1 %v2870_v7 }
  0x7a   :  { %720 = vmatpush1.msra.mxu1 %v2878_v9 }
  0x7b   :  { %721 = vmatprep.subr.mxu1 %v2885_v16 }
  0x7c   :  { %722 = vmatpush1.msra.mxu1 %v2891_v52 }
  0x7d   :  { %723 = vmatprep.subr.mxu1 %v2898_v18 }
  0x7e   :  { %724 = vmatpush1.msra.mxu1 %v2906_v20  ;;  %v106_v20 = vrot.slane %v101_v5, %v105_v55 }
  0x7f   :  { %725 = vmatprep.subr.mxu1 %v2913_v24 }
  0x80   :  { %726 = vmatpush1.msra.mxu1 %v2919_v62 }
  0x81   :  { %727 = vmatprep.subr.mxu1 %v2926_v3 }
  0x82   :  { %728 = vmatpush1.msra.mxu1 %v2934_v53 }
  0x83   :  { %870 = vmatprep.subr.mxu1 %v2719_v26 }
  0xe2   :  { %v189_v63 = vpop.f32.mrf.mxu1 }
  0xe3   :  { %v190_v2 = vadd.f32 %v189_v63, %v106_v20 }
  0xe4   :  { %v191_v59 = vpop.f32.mrf.mxu1 }
  0xe7   :  { %v195_v24 = vpop.f32.mrf.mxu1 }
  0xe8   :  { %v2984_v62 = vadd.f32 %v195_v24, %v106_v20 }
  0xe9   :  { %v197_v3 = vpop.f32.mrf.mxu1 }
  0xea   :  { %4057 = vst [vmem:[#allocation30_spill] sm:$0xff] %v2984_v62  ;;  %v2986_v18 = vadd.f32 %v197_v3, %v110_v57  ;;  %v117_v62 = vsub.s32 3, %v104_v14 }
  0xeb   :  { %v201_v53 = vpop.f32.mrf.mxu1 }
  0xec   :  { %4058 = vst [vmem:[#allocation31_spill] sm:$0xff] %v2986_v18  ;;  %v2988_v26 = vadd.f32 %v201_v53, %v106_v20 }
  0xed   :  { %v203_v4 = vpop.f32.mrf.mxu1 }
  0xee   :  { %4059 = vst [vmem:[#allocation32_spill] sm:$0xff] %v2988_v26  ;;  %v2990_v52 = vadd.f32 %v203_v4, %v110_v57 }
  0xef   :  { %v207_v16 = vpop.f32.mrf.mxu1 }
  0xf0   :  { %4060 = vst [vmem:[#allocation33_spill] sm:$0xff] %v2990_v52  ;;  %v2992_v51 = vadd.f32 %v207_v16, %v106_v20 }
  0xf1   :  { %v209_v9 = vpop.f32.mrf.mxu1 }
  0xf2   :  { %4061 = vst [vmem:[#allocation34_spill] sm:$0xff] %v2992_v51  ;;  %v2994_v49 = vadd.f32 %v209_v9, %v110_v57 }
  0xf3   :  { %v213_v55 = vpop.f32.mrf.mxu1 }
  0xf4   :  { %4062 = vst [vmem:[#allocation35_spill] sm:$0xff] %v2994_v49  ;;  %v2996_v7 = vadd.f32 %v213_v55, %v106_v20 }
  0xf5   :  { %v215_v61 = vpop.f32.mrf.mxu1 }
  0xf6   :  { %4063 = vst [vmem:[#allocation36_spill] sm:$0xff] %v2996_v7  ;;  %v2998_v24 = vadd.f32 %v215_v61, %v110_v57  ;;  %v113_v61 = vsub.s32 2, %v104_v14 }
  0xf7   :  { %v219_v3 = vpop.f32.mrf.mxu1 }
  0xf8   :  { %4064 = vst [vmem:[#allocation37_spill] sm:$0xff] %v2998_v24  ;;  %v3000_v18 = vadd.f32 %v219_v3, %v106_v20 }
  0xf9   :  { %v221_v53 = vpop.f32.mrf.mxu1 }
  0xfa   :  { %4065 = vst [vmem:[#allocation38_spill] sm:$0xff] %v3000_v18  ;;  %v3002_v26 = vadd.f32 %v221_v53, %v110_v57  ;;  %v114_v18 = vrot.slane %v101_v5, %v113_v61  ;;  %v118_v53 = vrot.slane %v101_v5, %v117_v62 }
  0xfb   :  { %v225_v4 = vpop.f32.mrf.mxu1 }
  0xfc   :  { %4066 = vst [vmem:[#allocation39_spill] sm:$0xff] %v3002_v26  ;;  %v3004_v52 = vadd.f32 %v225_v4, %v106_v20 }
  0xfd   :  { %v227_v16 = vpop.f32.mrf.mxu1 }
  0xfe   :  { %4067 = vst [vmem:[#allocation40_spill] sm:$0xff] %v3004_v52  ;;  %v3006_v51 = vadd.f32 %v227_v16, %v110_v57 }
  0xff   :  { %v231_v9 = vpop.f32.mrf.mxu1 }
 0x100   :  { %4068 = vst [vmem:[#allocation41_spill] sm:$0xff] %v3006_v51  ;;  %v3008_v49 = vadd.f32 %v231_v9, %v106_v20  ;;  %v520_v9 = vpop.f32.mrf.mxu0 }
 0x101   :  { %v233_v55 = vpop.f32.mrf.mxu1 }
 0x102   :  { %4069 = vst [vmem:[#allocation42_spill] sm:$0xff] %v3008_v49  ;;  %v3010_v7 = vadd.f32 %v233_v55, %v110_v57  ;;  %v522_v14 = vpop.f32.mrf.mxu0 }
 0x103   :  { %v302_v24 = vpop.f32.mrf.mxu1 }
 0x104   :  { %4070 = vst [vmem:[#allocation43_spill] sm:$0xff] %v3010_v7  ;;  %v192_v7 = vadd.f32 %v191_v59, %v110_v57 }
 0x105   :  { %v304_v3 = vpop.f32.mrf.mxu1 }
 0x106   :  { %v597_v62 = vadd.f32 %v522_v14, %v192_v7 }
 0x107   :  { %v308_v47 = vpop.f32.mrf.mxu1 }
 0x108   :  { %v3012_v26 = vadd.f32 %v308_v47, %v114_v18 }
 0x109   :  { %v310_v4 = vpop.f32.mrf.mxu1 }
 0x10a   :  { %4071 = vst [vmem:[#allocation44_spill] sm:$0xff] %v3012_v26  ;;  %v3014_v52 = vadd.f32 %v310_v4, %v118_v53 }
 0x10b   :  { %v314_v16 = vpop.f32.mrf.mxu1 }
 0x10c   :  { %4072 = vst [vmem:[#allocation45_spill] sm:$0xff] %v3014_v52  ;;  %v3016_v51 = vadd.f32 %v314_v16, %v114_v18  ;;  %v596_v16 = vadd.f32 %v520_v9, %v190_v2  ;;  %v303_v9 = vadd.f32 %v302_v24, %v114_v18 }
 0x10d   :  { %v316_v49 = vpop.f32.mrf.mxu1 }
 0x10e   :  { %4073 = vst [vmem:[#allocation46_spill] sm:$0xff] %v3016_v51  ;;  %v3018_v42 = vadd.f32 %v316_v49, %v118_v53  ;;  %v604_v49 = vmul.f32 0.5, %v597_v62  ;;  %v600_v59 = vmul.f32 0.5, %v596_v16  ;;  %v305_v16 = vadd.f32 %v304_v3, %v118_v53 }
 0x10f   :  { %v320_v55 = vpop.f32.mrf.mxu1 }
 0x110   :  { %4074 = vst [vmem:[#allocation47_spill] sm:$0xff] %v3018_v42  ;;  %v3020_v45 = vadd.f32 %v320_v55, %v114_v18  ;;  %2065 = vtanh.f32 %v604_v49 }
 0x111   :  { %v322_v61 = vpop.f32.mrf.mxu1  ;;  %2067 = vtanh.f32 %v600_v59 }
 0x112   :  { %4075 = vst [vmem:[#allocation48_spill] sm:$0xff] %v3020_v45  ;;  %v3022_v5 = vadd.f32 %v322_v61, %v118_v53 }
 0x113   :  { %v326_v47 = vpop.f32.mrf.mxu1 }
 0x114   :  { %4076 = vst [vmem:[#allocation49_spill] sm:$0xff] %v3022_v5  ;;  %v3024_v4 = vadd.f32 %v326_v47, %v114_v18  ;;  %v3322_v5 = vld [vmem:[%s3916_s2 + $0x28] sm:$0xff] }
 0x115   :  { %v328_v52 = vpop.f32.mrf.mxu1 }
 0x116   :  { %4077 = vst [vmem:[#allocation50_spill] sm:$0xff] %v3024_v4  ;;  %v3026_v51 = vadd.f32 %v328_v52, %v118_v53  ;;  %v3315_v4 = vld [vmem:[%s3916_s2 + $0x40] sm:$0xff] }
 0x117   :  { %v332_v26 = vpop.f32.mrf.mxu1 }
 0x118   :  { %4078 = vst [vmem:[#allocation51_spill] sm:$0xff] %v3026_v51  ;;  %v3028_v42 = vadd.f32 %v332_v26, %v114_v18  ;;  %v3308_v51 = vld [vmem:[%s3916_s2 + $0x48] sm:$0xff] }
 0x119   :  { %v334_v57 = vpop.f32.mrf.mxu1 }
 0x11a   :  { %4079 = vst [vmem:[#allocation52_spill] sm:$0xff] %v3028_v42  ;;  %v3030_v55 = vadd.f32 %v334_v57, %v118_v53 }
 0x11b   :  { %v338_v45 = vpop.f32.mrf.mxu1 }
 0x11c   :  { %4080 = vst [vmem:[#allocation53_spill] sm:$0xff] %v3030_v55  ;;  %v3032_v63 = vadd.f32 %v338_v45, %v114_v18 }
 0x11d   :  { %v340_v20 = vpop.f32.mrf.mxu1  ;;  %v2066_v49 = vpop.eup %2065 }
 0x11e   :  { %4081 = vst [vmem:[#allocation54_spill] sm:$0xff] %v3032_v63  ;;  %v3034_v7 = vadd.f32 %v340_v20, %v118_v53  ;;  %v2068_v45 = vpop.eup %2067  ;;  %v606_v63 = vmul.f32 0.5, %v2066_v49 }
 0x11f   :  { %v344_v14 = vpop.f32.mrf.mxu1  ;;  %v602_v59 = vmul.f32 0.5, %v2068_v45 }
 0x120   :  { %4082 = vst [vmem:[#allocation55_spill] sm:$0xff] %v3034_v7  ;;  %v3036_v2 = vadd.f32 %v344_v14, %v114_v18  ;;  %v607_v20 = vadd.f32 0.5, %v606_v63  ;;  %v4108_v63 = vmov 0.0  }
 0x121   :  { %v346_v52 = vpop.f32.mrf.mxu1  ;;  %v603_v7 = vadd.f32 0.5, %v602_v59  ;;  %v4113_v59 = vld [vmem:[#allocation31_spill] sm:$0xff] }
 0x122   :  { %4083 = vst [vmem:[#allocation56_spill] sm:$0xff] %v3036_v2  ;;  %v3038_v61 = vadd.f32 %v346_v52, %v118_v53  ;;  %v613_v2 = vmul.f32 0.0, %v607_v20 }
 0x123   :  { %v591_v26 = vpop.f32.mrf.mxu1 }
 0x124   :  { %4084 = vst [vmem:[#allocation57_spill] sm:$0xff] %v3038_v61  ;;  %v598_v47 = vadd.f32 %v591_v26, %v303_v9  ;;  %v4111_v26 = vld [vmem:[#allocation17_spill] sm:$0xff]  ;;  %v3287_v61 = vld [vmem:[%s3916_s2 + $0x80] sm:$0xff] }
 0x125   :  { %v593_v62 = vpop.f32.mrf.mxu1 }
 0x126   :  { %2069 = vtanh.f32 %v598_v47  ;;  %v599_v57 = vadd.f32 %v593_v62, %v305_v16  ;;  %v4112_v62 = vld [vmem:[#allocation30_spill] sm:$0xff] }
 0x128   :  { %v609_v55 = vmul.f32 0.5, %v599_v57 }
 0x12a   :  { %2071 = vtanh.f32 %v609_v55  ;;  %v4107_v55 = vld [vmem:[#allocation16_spill] sm:$0xff] }
 0x133   :  { %v2070_v14 = vpop.eup %2069 }
 0x134   :  { %v614_v42 = vmul.f32 %v2070_v14, %v603_v7  ;;  %v4109_v7 = vld [vmem:[#allocation29_spill] sm:$0xff]  ;;  %v4114_v14 = vld [vmem:[#allocation44_spill] sm:$0xff] }
 0x136   :  { %v3040_v18 = vadd.f32 %v614_v42, %v613_v2  ;;  %v4106_v42 = vld [vmem:[#allocation28_spill] sm:$0xff]  ;;  %v3114_v2 = vld [vmem:[%s3916_s2 + $0x1e8] sm:$0xff] }
 0x137   :  { %v2072_v24 = vpop.eup %2071 }
 0x138   :  { %2073 = vtanh.f32 %v3040_v18  ;;  %v611_v52 = vmul.f32 0.5, %v2072_v24 }
 0x13a   :  { %v612_v3 = vadd.f32 0.5, %v611_v52 }
 0x145   :  { %v2074_v53 = vpop.eup %2073 }
 0x146   :  { %v3043_v9 = vmul.f32 %v2074_v53, %v612_v3  ;;  %v4115_v53 = vld [vmem:[#allocation45_spill] sm:$0xff] }
 0x148   :  { %4085 = vst [vmem:[#allocation58_spill] sm:$0xff] %v3043_v9  ;;  %691 = vmatmul.mubr.f32.vlgmr.msra.gmra.mxu0 %v3043_v9  ;;  %762 = vmatmul.mubr.f32.vlgmr.msra.gmra.mxu1 %v3043_v9  ;;  %v3301_v9 = vld [vmem:[%s3916_s2 + $0x60] sm:$0xff] }
 0x149   :  { %800 = vmatpush1.msra.mxu0 %v2283_v6  ;;  %871 = vmatpush1.msra.mxu1 %v2724_v28  ;;  %v4086_v6 = vld [vmem:[#allocation18_spill] sm:$0xff] }
 0x14a   :  { %801 = vmatprep.subr.mxu0 %v2292_v8  ;;  %872 = vmatprep.subr.mxu1 %v2730_v30  ;;  %v4087_v8 = vld [vmem:[#allocation6_spill] sm:$0xff]  ;;  %4110 = vst [vmem:[#allocation18_spill] sm:$0xff] %v3114_v2 }
 0x14b   :  { %802 = vmatpush1.msra.mxu0 %v2301_v10  ;;  %873 = vmatpush1.msra.mxu1 %v2738_v34  ;;  %v4088_v10 = vld [vmem:[#allocation19_spill] sm:$0xff] }
 0x14c   :  { %803 = vmatprep.subr.mxu0 %v2306_v11  ;;  %874 = vmatprep.subr.mxu1 %v2745_v36  ;;  %v4089_v11 = vld [vmem:[#allocation7_spill] sm:$0xff]  ;;  %4117 = vst [vmem:[#allocation19_spill] sm:$0xff] %v3287_v61 }
 0x14d   :  { %804 = vmatpush1.msra.mxu0 %v2315_v13  ;;  %875 = vmatpush1.msra.mxu1 %v2751_v0  ;;  %v4090_v13 = vld [vmem:[#allocation20_spill] sm:$0xff] }
 0x14e   :  { %805 = vmatprep.subr.mxu0 %v2324_v15  ;;  %876 = vmatprep.subr.mxu1 %v2758_v38  ;;  %v4091_v15 = vld [vmem:[#allocation8_spill] sm:$0xff] }
 0x14f   :  { %806 = vmatpush1.msra.mxu0 %v2333_v17  ;;  %877 = vmatpush1.msra.mxu1 %v2766_v40  ;;  %v4092_v17 = vld [vmem:[#allocation21_spill] sm:$0xff]  ;;  %4119 = vst [vmem:[#allocation8_spill] sm:$0xff] %v3301_v9 }
 0x150   :  { %807 = vmatprep.subr.mxu0 %v2342_v19  ;;  %878 = vmatprep.subr.mxu1 %v2773_v44  ;;  %v4093_v19 = vld [vmem:[#allocation9_spill] sm:$0xff] }
 0x151   :  { %808 = vmatpush1.msra.mxu0 %v2351_v21  ;;  %879 = vmatpush1.msra.mxu1 %v2779_v12  ;;  %v4094_v21 = vld [vmem:[#allocation22_spill] sm:$0xff]  ;;  %4120 = vst [vmem:[#allocation9_spill] sm:$0xff] %v3308_v51 }
 0x152   :  { %809 = vmatprep.subr.mxu0 %v2360_v23  ;;  %880 = vmatprep.subr.mxu1 %v2786_v46  ;;  %v4095_v23 = vld [vmem:[#allocation10_spill] sm:$0xff] }
 0x153   :  { %810 = vmatpush1.msra.mxu0 %v2369_v25  ;;  %881 = vmatpush1.msra.mxu1 %v2794_v48  ;;  %v4096_v25 = vld [vmem:[#allocation23_spill] sm:$0xff]  ;;  %4121 = vst [vmem:[#allocation10_spill] sm:$0xff] %v3315_v4 }
 0x154   :  { %811 = vmatprep.subr.mxu0 %v2378_v27  ;;  %882 = vmatprep.subr.mxu1 %v2801_v50  ;;  %v4097_v27 = vld [vmem:[#allocation11_spill] sm:$0xff] }
 0x155   :  { %812 = vmatpush1.msra.mxu0 %v2387_v29  ;;  %883 = vmatpush1.msra.mxu1 %v2807_v22  ;;  %v4098_v29 = vld [vmem:[#allocation24_spill] sm:$0xff]  ;;  %4122 = vst [vmem:[#allocation11_spill] sm:$0xff] %v3322_v5 }
 0x156   :  { %813 = vmatprep.subr.mxu0 %v2396_v31  ;;  %884 = vmatprep.subr.mxu1 %v2814_v54  ;;  %v4099_v31 = vld [vmem:[#allocation12_spill] sm:$0xff] }
 0x157   :  { %814 = vmatpush1.msra.mxu0 %v2405_v33  ;;  %885 = vmatpush1.msra.mxu1 %v2822_v56  ;;  %v4100_v33 = vld [vmem:[#allocation25_spill] sm:$0xff] }
 0x158   :  { %815 = vmatprep.subr.mxu0 %v2414_v35  ;;  %886 = vmatprep.subr.mxu1 %v2829_v58  ;;  %v4101_v35 = vld [vmem:[#allocation13_spill] sm:$0xff] }
 0x159   :  { %816 = vmatpush1.msra.mxu0 %v2423_v37  ;;  %887 = vmatpush1.msra.mxu1 %v2835_v32  ;;  %v4102_v37 = vld [vmem:[#allocation26_spill] sm:$0xff] }
 0x15a   :  { %817 = vmatprep.subr.mxu0 %v2432_v39  ;;  %888 = vmatprep.subr.mxu1 %v2842_v60  ;;  %v4103_v39 = vld [vmem:[#allocation14_spill] sm:$0xff] }
 0x15b   :  { %818 = vmatpush1.msra.mxu0 %v2441_v41  ;;  %889 = vmatpush1.msra.mxu1 %v2850_v1  ;;  %v4104_v41 = vld [vmem:[#allocation27_spill] sm:$0xff] }
 0x15c   :  { %819 = vmatprep.subr.mxu0 %v2450_v43  ;;  %890 = vmatprep.subr.mxu1 %v4086_v6  ;;  %v4105_v43 = vld [vmem:[#allocation15_spill] sm:$0xff] }
 0x15d   :  { %820 = vmatpush1.msra.mxu0 %v4087_v8  ;;  %891 = vmatpush1.msra.mxu1 %v4088_v10 }
 0x15e   :  { %821 = vmatprep.subr.mxu0 %v4089_v11  ;;  %892 = vmatprep.subr.mxu1 %v4090_v13 }
 0x15f   :  { %822 = vmatpush1.msra.mxu0 %v4091_v15  ;;  %893 = vmatpush1.msra.mxu1 %v4092_v17 }
 0x160   :  { %823 = vmatprep.subr.mxu0 %v4093_v19  ;;  %894 = vmatprep.subr.mxu1 %v4094_v21 }
 0x161   :  { %824 = vmatpush1.msra.mxu0 %v4095_v23  ;;  %895 = vmatpush1.msra.mxu1 %v4096_v25 }
 0x162   :  { %825 = vmatprep.subr.mxu0 %v4097_v27  ;;  %896 = vmatprep.subr.mxu1 %v4098_v29 }
 0x163   :  { %826 = vmatpush1.msra.mxu0 %v4099_v31  ;;  %897 = vmatpush1.msra.mxu1 %v4100_v33 }
 0x164   :  { %827 = vmatprep.subr.mxu0 %v4101_v35  ;;  %898 = vmatprep.subr.mxu1 %v4102_v37 }
 0x165   :  { %828 = vmatpush1.msra.mxu0 %v4103_v39  ;;  %899 = vmatpush1.msra.mxu1 %v4104_v41 }
 0x166   :  { %829 = vmatprep.subr.mxu0 %v4105_v43  ;;  %900 = vmatprep.subr.mxu1 %v4106_v42 }
 0x167   :  { %830 = vmatpush1.msra.mxu0 %v4107_v55  ;;  %863 = vmatprep.mubr.f32.mxu0 %v4108_v63 }
 0x168   :  { %901 = vmatpush1.msra.mxu1 %v4109_v7  ;;  %934 = vmatprep.mubr.f32.mxu1 %v4108_v63 }
 0x169   :  { %972 = vmatprep.subr.mxu0 %v3114_v2  ;;  %1043 = vmatprep.subr.mxu1 %v4111_v26 }
 0x208   :  { %v692_v47 = vpop.f32.mrf.mxu0  ;;  %v763_v57 = vpop.f32.mrf.mxu1 }
 0x209   :  { %v768_v16 = vadd.f32 %v692_v47, %v4112_v62  ;;  %v770_v24 = vadd.f32 %v763_v57, %v4114_v14  ;;  %v3147_v14 = vld [vmem:[%s3916_s2 + $0x1c0] sm:$0xff] }
 0x20a   :  { %v694_v49 = vpop.f32.mrf.mxu0  ;;  %v765_v3 = vpop.f32.mrf.mxu1 }
 0x20b   :  { %v772_v45 = vmul.f32 0.5, %v768_v16  ;;  %v769_v20 = vadd.f32 %v694_v49, %v4113_v59  ;;  %v771_v8 = vadd.f32 %v765_v3, %v4115_v53  ;;  %v3168_v3 = vld [vmem:[%s3916_s2 + $0x188] sm:$0xff]  ;;  %v3175_v53 = vld [vmem:[%s3916_s2 + $0x180] sm:$0xff] }
 0x20d   :  { %2075 = vtanh.f32 %v772_v45  ;;  %v776_v52 = vmul.f32 0.5, %v769_v20  ;;  %v781_v11 = vmul.f32 0.5, %v771_v8  ;;  %v3133_v20 = vld [vmem:[%s3916_s2 + $0x1e0] sm:$0xff]  ;;  %v3182_v8 = vld [vmem:[%s3916_s2 + $0x168] sm:$0xff] }
 0x20f   :  { %2077 = vtanh.f32 %v776_v52  ;;  %v3161_v52 = vld [vmem:[%s3916_s2 + $0x1a0] sm:$0xff] }
 0x210   :  { %2079 = vtanh.f32 %v770_v24  ;;  %v3154_v24 = vld [vmem:[%s3916_s2 + $0x1a8] sm:$0xff] }
 0x211   :  { %2081 = vtanh.f32 %v781_v11  ;;  %v3189_v11 = vld [vmem:[%s3916_s2 + $0x160] sm:$0xff] }
 0x21a   :  { %v2076_v15 = vpop.eup %2075 }
 0x21b   :  { %v774_v19 = vmul.f32 0.5, %v2076_v15  ;;  %v3196_v15 = vld [vmem:[%s3916_s2 + $0x148] sm:$0xff] }
 0x21c   :  { %v2078_v23 = vpop.eup %2077 }
 0x21d   :  { %v775_v27 = vadd.f32 0.5, %v774_v19  ;;  %v778_v31 = vmul.f32 0.5, %v2078_v23  ;;  %v2080_v35 = vpop.eup %2079  ;;  %v3203_v19 = vld [vmem:[%s3916_s2 + $0x140] sm:$0xff]  ;;  %v3210_v23 = vld [vmem:[%s3916_s2 + $0x128] sm:$0xff] }
 0x21e   :  { %v2082_v16 = vpop.eup %2081 }
 0x21f   :  { %v779_v39 = vadd.f32 0.5, %v778_v31  ;;  %v786_v43 = vmul.f32 %v2080_v35, %v775_v27  ;;  %v783_v57 = vmul.f32 0.5, %v2082_v16  ;;  %v3217_v27 = vld [vmem:[%s3916_s2 + $0x120] sm:$0xff]  ;;  %v3224_v31 = vld [vmem:[%s3916_s2 + $0x108] sm:$0xff] }
 0x220   :  { %v3231_v35 = vld [vmem:[%s3916_s2 + $0x100] sm:$0xff] }
 0x221   :  { %v785_v47 = vmul.f32 %v779_v39, %v3040_v18  ;;  %v784_v49 = vadd.f32 0.5, %v783_v57  ;;  %v3140_v18 = vld [vmem:[%s3916_s2 + $0x1c8] sm:$0xff]  ;;  %v3259_v16 = vld [vmem:[%s3916_s2 + $0xc0] sm:$0xff] }
 0x222   :  { %v3238_v39 = vld [vmem:[%s3916_s2 + $0xe8] sm:$0xff] }
 0x223   :  { %v3123_v62 = vadd.f32 %v786_v43, %v785_v47  ;;  %v3245_v43 = vld [vmem:[%s3916_s2 + $0xe0] sm:$0xff]  ;;  %v3252_v47 = vld [vmem:[%s3916_s2 + $0xc8] sm:$0xff] }
 0x224   :  { %v3266_v57 = vld [vmem:[%s3916_s2 + $0xa8] sm:$0xff] }
 0x225   :  { %2083 = vtanh.f32 %v3123_v62 }
 0x232   :  { %v2084_v45 = vpop.eup %2083 }
 0x233   :  { %v3126_v59 = vmul.f32 %v2084_v45, %v784_v49  ;;  %v3273_v49 = vld [vmem:[%s3916_s2 + $0xa0] sm:$0xff]  ;;  %v3280_v45 = vld [vmem:[%s3916_s2 + $0x88] sm:$0xff] }
 0x235   :  { %4116 = vst [vmem:[#allocation6_spill] sm:$0xff] %v3126_v59  ;;  %864 = vmatmul.mubr.f32.vlgmr.msra.gmra.mxu0 %v3126_v59  ;;  %935 = vmatmul.mubr.f32.vlgmr.msra.gmra.mxu1 %v3126_v59  ;;  %v3294_v59 = vld [vmem:[%s3916_s2 + $0x68] sm:$0xff] }
 0x236   :  { %973 = vmatpush1.msra.mxu0 %v3133_v20  ;;  %1044 = vmatpush1.msra.mxu1 %v2724_v28  ;;  %4118 = vst [vmem:[#allocation7_spill] sm:$0xff] %v3294_v59 }
 0x237   :  { %974 = vmatprep.subr.mxu0 %v3140_v18  ;;  %1045 = vmatprep.subr.mxu1 %v2730_v30 }
 0x238   :  { %975 = vmatpush1.msra.mxu0 %v3147_v14  ;;  %1046 = vmatpush1.msra.mxu1 %v2738_v34 }
 0x239   :  { %976 = vmatprep.subr.mxu0 %v3154_v24  ;;  %1047 = vmatprep.subr.mxu1 %v2745_v36 }
 0x23a   :  { %977 = vmatpush1.msra.mxu0 %v3161_v52  ;;  %1048 = vmatpush1.msra.mxu1 %v2751_v0 }
 0x23b   :  { %978 = vmatprep.subr.mxu0 %v3168_v3  ;;  %1049 = vmatprep.subr.mxu1 %v2758_v38 }
 0x23c   :  { %979 = vmatpush1.msra.mxu0 %v3175_v53  ;;  %1050 = vmatpush1.msra.mxu1 %v2766_v40 }
 0x23d   :  { %980 = vmatprep.subr.mxu0 %v3182_v8  ;;  %1051 = vmatprep.subr.mxu1 %v2773_v44 }
 0x23e   :  { %981 = vmatpush1.msra.mxu0 %v3189_v11  ;;  %1052 = vmatpush1.msra.mxu1 %v2779_v12 }
 0x23f   :  { %982 = vmatprep.subr.mxu0 %v3196_v15  ;;  %1053 = vmatprep.subr.mxu1 %v2786_v46 }
 0x240   :  { %983 = vmatpush1.msra.mxu0 %v3203_v19  ;;  %1054 = vmatpush1.msra.mxu1 %v2794_v48 }
 0x241   :  { %984 = vmatprep.subr.mxu0 %v3210_v23  ;;  %1055 = vmatprep.subr.mxu1 %v2801_v50 }
 0x242   :  { %985 = vmatpush1.msra.mxu0 %v3217_v27  ;;  %1056 = vmatpush1.msra.mxu1 %v2807_v22 }
 0x243   :  { %986 = vmatprep.subr.mxu0 %v3224_v31  ;;  %1057 = vmatprep.subr.mxu1 %v2814_v54 }
 0x244   :  { %987 = vmatpush1.msra.mxu0 %v3231_v35  ;;  %1058 = vmatpush1.msra.mxu1 %v2822_v56 }
 0x245   :  { %988 = vmatprep.subr.mxu0 %v3238_v39  ;;  %1059 = vmatprep.subr.mxu1 %v2829_v58 }
 0x246   :  { %989 = vmatpush1.msra.mxu0 %v3245_v43  ;;  %1060 = vmatpush1.msra.mxu1 %v2835_v32 }
 0x247   :  { %990 = vmatprep.subr.mxu0 %v3252_v47  ;;  %1061 = vmatprep.subr.mxu1 %v2842_v60 }
 0x248   :  { %991 = vmatpush1.msra.mxu0 %v3259_v16  ;;  %1062 = vmatpush1.msra.mxu1 %v2850_v1 }
 0x249   :  { %992 = vmatprep.subr.mxu0 %v3266_v57  ;;  %1063 = vmatprep.subr.mxu1 %v4086_v6 }
 0x24a   :  { %993 = vmatpush1.msra.mxu0 %v3273_v49  ;;  %1064 = vmatpush1.msra.mxu1 %v4088_v10 }
 0x24b   :  { %994 = vmatprep.subr.mxu0 %v3280_v45  ;;  %1065 = vmatprep.subr.mxu1 %v4090_v13 }
 0x24c   :  { %995 = vmatpush1.msra.mxu0 %v3287_v61  ;;  %1066 = vmatpush1.msra.mxu1 %v4092_v17 }
 0x24d   :  { %996 = vmatprep.subr.mxu0 %v3294_v59  ;;  %1067 = vmatprep.subr.mxu1 %v4094_v21 }
 0x24e   :  { %997 = vmatpush1.msra.mxu0 %v3301_v9  ;;  %1068 = vmatpush1.msra.mxu1 %v4096_v25 }
 0x24f   :  { %998 = vmatprep.subr.mxu0 %v3308_v51  ;;  %1069 = vmatprep.subr.mxu1 %v4098_v29  ;;  %v3329_v29 = vld [vmem:[%s3916_s2 + $0x20] sm:$0xff]  ;;  %v4126_v51 = vld [vmem:[#allocation33_spill] sm:$0xff] }
 0x250   :  { %999 = vmatpush1.msra.mxu0 %v3315_v4  ;;  %1070 = vmatpush1.msra.mxu1 %v4100_v33  ;;  %4123 = vst [vmem:[#allocation12_spill] sm:$0xff] %v3329_v29  ;;  %v3336_v33 = vld [vmem:[%s3916_s2 + $0x8] sm:$0xff] }
 0x251   :  { %1000 = vmatprep.subr.mxu0 %v3322_v5  ;;  %1071 = vmatprep.subr.mxu1 %v4102_v37  ;;  %4124 = vst [vmem:[#allocation13_spill] sm:$0xff] %v3336_v33 }
 0x252   :  { %1001 = vmatpush1.msra.mxu0 %v3329_v29  ;;  %1072 = vmatpush1.msra.mxu1 %v4104_v41  ;;  %v4125_v29 = vld [vmem:[#allocation32_spill] sm:$0xff] }
 0x253   :  { %1002 = vmatprep.subr.mxu0 %v3336_v33  ;;  %1073 = vmatprep.subr.mxu1 %v4106_v42 }
 0x254   :  { %1003 = vmatpush1.msra.mxu0 %v4107_v55  ;;  %1036 = vmatprep.mubr.f32.mxu0 %v4108_v63  ;;  %v4127_v55 = vld [vmem:[#allocation46_spill] sm:$0xff] }
 0x255   :  { %1074 = vmatpush1.msra.mxu1 %v4109_v7  ;;  %1107 = vmatprep.mubr.f32.mxu1 %v4108_v63  ;;  %v4128_v63 = vld [vmem:[#allocation47_spill] sm:$0xff] }
 0x256   :  { %1145 = vmatprep.subr.mxu0 %v3114_v2  ;;  %1216 = vmatprep.subr.mxu1 %v4111_v26 }
 0x2f5   :  { %v865_v41 = vpop.f32.mrf.mxu0  ;;  %v936_v5 = vpop.f32.mrf.mxu1 }
 0x2f6   :  { %v941_v37 = vadd.f32 %v865_v41, %v4125_v29  ;;  %v943_v25 = vadd.f32 %v936_v5, %v4127_v55 }
 0x2f7   :  { %v867_v4 = vpop.f32.mrf.mxu0  ;;  %v938_v7 = vpop.f32.mrf.mxu1 }
 0x2f8   :  { %v945_v33 = vmul.f32 0.5, %v941_v37  ;;  %v942_v42 = vadd.f32 %v867_v4, %v4126_v51  ;;  %v944_v21 = vadd.f32 %v938_v7, %v4128_v63 }
 0x2fa   :  { %2085 = vtanh.f32 %v945_v33  ;;  %v949_v9 = vmul.f32 0.5, %v942_v42  ;;  %v954_v2 = vmul.f32 0.5, %v944_v21 }
 0x2fc   :  { %2087 = vtanh.f32 %v949_v9 }
 0x2fd   :  { %2089 = vtanh.f32 %v943_v25 }
 0x2fe   :  { %2091 = vtanh.f32 %v954_v2 }
 0x307   :  { %v2086_v59 = vpop.eup %2085 }
 0x308   :  { %v947_v26 = vmul.f32 0.5, %v2086_v59  ;;  %v4154_v59 = vld [vmem:[#allocation48_spill] sm:$0xff] }
 0x309   :  { %v2088_v17 = vpop.eup %2087 }
 0x30a   :  { %v948_v61 = vadd.f32 0.5, %v947_v26  ;;  %v951_v29 = vmul.f32 0.5, %v2088_v17  ;;  %v2090_v41 = vpop.eup %2089  ;;  %v4152_v17 = vld [vmem:[#allocation34_spill] sm:$0xff]  ;;  %v4153_v26 = vld [vmem:[#allocation35_spill] sm:$0xff] }
 0x30b   :  { %v2092_v5 = vpop.eup %2091 }
 0x30c   :  { %v952_v37 = vadd.f32 0.5, %v951_v29  ;;  %v959_v13 = vmul.f32 %v2090_v41, %v948_v61  ;;  %v956_v9 = vmul.f32 0.5, %v2092_v5  ;;  %v4149_v61 = vld [vmem:[#allocation29_spill] sm:$0xff] }
 0x30e   :  { %v958_v51 = vmul.f32 %v952_v37, %v3123_v62  ;;  %v957_v25 = vadd.f32 0.5, %v956_v9  ;;  %v4155_v37 = vld [vmem:[#allocation49_spill] sm:$0xff] }
 0x310   :  { %v3351_v4 = vadd.f32 %v959_v13, %v958_v51 }
 0x312   :  { %2093 = vtanh.f32 %v3351_v4 }
 0x31f   :  { %v2094_v33 = vpop.eup %2093 }
 0x320   :  { %v3354_v21 = vmul.f32 %v2094_v33, %v957_v25 }
 0x322   :  { %4129 = vst [vmem:[#allocation14_spill] sm:$0xff] %v3354_v21  ;;  %1037 = vmatmul.mubr.f32.vlgmr.msra.gmra.mxu0 %v3354_v21  ;;  %1108 = vmatmul.mubr.f32.vlgmr.msra.gmra.mxu1 %v3354_v21  ;;  %v3648_v21 = vld [vmem:[%s3916_s2 + $0x18] sm:$0xff] }
 0x323   :  { %1146 = vmatpush1.msra.mxu0 %v3133_v20  ;;  %1217 = vmatpush1.msra.mxu1 %v2724_v28  ;;  %v4130_v28 = vld [vmem:[#allocation20_spill] sm:$0xff] }
 0x324   :  { %1147 = vmatprep.subr.mxu0 %v3140_v18  ;;  %1218 = vmatprep.subr.mxu1 %v2730_v30  ;;  %v4131_v30 = vld [vmem:[#allocation19_spill] sm:$0xff]  ;;  %4165 = vst [vmem:[#allocation20_spill] sm:$0xff] %v3648_v21 }
 0x325   :  { %1148 = vmatpush1.msra.mxu0 %v3147_v14  ;;  %1219 = vmatpush1.msra.mxu1 %v2738_v34  ;;  %v4132_v34 = vld [vmem:[#allocation21_spill] sm:$0xff] }
 0x326   :  { %1149 = vmatprep.subr.mxu0 %v3154_v24  ;;  %1220 = vmatprep.subr.mxu1 %v2745_v36  ;;  %v4133_v36 = vld [vmem:[#allocation7_spill] sm:$0xff] }
 0x327   :  { %1150 = vmatpush1.msra.mxu0 %v3161_v52  ;;  %1221 = vmatpush1.msra.mxu1 %v2751_v0  ;;  %v4134_v0 = vld [vmem:[#allocation22_spill] sm:$0xff] }
 0x328   :  { %1151 = vmatprep.subr.mxu0 %v3168_v3  ;;  %1222 = vmatprep.subr.mxu1 %v2758_v38  ;;  %v4135_v38 = vld [vmem:[#allocation8_spill] sm:$0xff] }
 0x329   :  { %1152 = vmatpush1.msra.mxu0 %v3175_v53  ;;  %1223 = vmatpush1.msra.mxu1 %v2766_v40  ;;  %v4136_v40 = vld [vmem:[#allocation23_spill] sm:$0xff] }
 0x32a   :  { %1153 = vmatprep.subr.mxu0 %v3182_v8  ;;  %1224 = vmatprep.subr.mxu1 %v2773_v44  ;;  %v4137_v44 = vld [vmem:[#allocation9_spill] sm:$0xff] }
 0x32b   :  { %1154 = vmatpush1.msra.mxu0 %v3189_v11  ;;  %1225 = vmatpush1.msra.mxu1 %v2779_v12  ;;  %v4138_v12 = vld [vmem:[#allocation24_spill] sm:$0xff] }
 0x32c   :  { %1155 = vmatprep.subr.mxu0 %v3196_v15  ;;  %1226 = vmatprep.subr.mxu1 %v2786_v46  ;;  %v4139_v46 = vld [vmem:[#allocation10_spill] sm:$0xff] }
 0x32d   :  { %1156 = vmatpush1.msra.mxu0 %v3203_v19  ;;  %1227 = vmatpush1.msra.mxu1 %v2794_v48  ;;  %v4140_v48 = vld [vmem:[#allocation25_spill] sm:$0xff] }
 0x32e   :  { %1157 = vmatprep.subr.mxu0 %v3210_v23  ;;  %1228 = vmatprep.subr.mxu1 %v2801_v50  ;;  %v4141_v50 = vld [vmem:[#allocation11_spill] sm:$0xff] }
 0x32f   :  { %1158 = vmatpush1.msra.mxu0 %v3217_v27  ;;  %1229 = vmatpush1.msra.mxu1 %v2807_v22  ;;  %v4142_v22 = vld [vmem:[#allocation26_spill] sm:$0xff] }
 0x330   :  { %1159 = vmatprep.subr.mxu0 %v3224_v31  ;;  %1230 = vmatprep.subr.mxu1 %v2814_v54  ;;  %v4143_v54 = vld [vmem:[#allocation12_spill] sm:$0xff] }
 0x331   :  { %1160 = vmatpush1.msra.mxu0 %v3231_v35  ;;  %1231 = vmatpush1.msra.mxu1 %v2822_v56  ;;  %v4144_v56 = vld [vmem:[#allocation27_spill] sm:$0xff] }
 0x332   :  { %1161 = vmatprep.subr.mxu0 %v3238_v39  ;;  %1232 = vmatprep.subr.mxu1 %v2829_v58  ;;  %v4145_v58 = vld [vmem:[#allocation13_spill] sm:$0xff] }
 0x333   :  { %1162 = vmatpush1.msra.mxu0 %v3245_v43  ;;  %1233 = vmatpush1.msra.mxu1 %v2835_v32  ;;  %v4146_v32 = vld [vmem:[#allocation28_spill] sm:$0xff] }
 0x334   :  { %1163 = vmatprep.subr.mxu0 %v3252_v47  ;;  %1234 = vmatprep.subr.mxu1 %v2842_v60  ;;  %v3421_v60 = vld [vmem:[%s3916_s2] sm:$0xff] }
 0x335   :  { %1164 = vmatpush1.msra.mxu0 %v3259_v16  ;;  %1235 = vmatpush1.msra.mxu1 %v2850_v1  ;;  %4147 = vst [vmem:[#allocation15_spill] sm:$0xff] %v3421_v60  ;;  %v4148_v1 = vmov 0.0  }
 0x336   :  { %1165 = vmatprep.subr.mxu0 %v3266_v57  ;;  %1236 = vmatprep.subr.mxu1 %v4086_v6  ;;  %v4150_v6 = vld [vmem:[#allocation18_spill] sm:$0xff] }
 0x337   :  { %1166 = vmatpush1.msra.mxu0 %v3273_v49  ;;  %1237 = vmatpush1.msra.mxu1 %v4088_v10  ;;  %v4151_v10 = vld [vmem:[#allocation17_spill] sm:$0xff] }
 0x338   :  { %1167 = vmatprep.subr.mxu0 %v3280_v45  ;;  %1238 = vmatprep.subr.mxu1 %v4130_v28 }
 0x339   :  { %1168 = vmatpush1.msra.mxu0 %v4131_v30  ;;  %1239 = vmatpush1.msra.mxu1 %v4132_v34 }
 0x33a   :  { %1169 = vmatprep.subr.mxu0 %v4133_v36  ;;  %1240 = vmatprep.subr.mxu1 %v4134_v0 }
 0x33b   :  { %1170 = vmatpush1.msra.mxu0 %v4135_v38  ;;  %1241 = vmatpush1.msra.mxu1 %v4136_v40 }
 0x33c   :  { %1171 = vmatprep.subr.mxu0 %v4137_v44  ;;  %1242 = vmatprep.subr.mxu1 %v4138_v12 }
 0x33d   :  { %1172 = vmatpush1.msra.mxu0 %v4139_v46  ;;  %1243 = vmatpush1.msra.mxu1 %v4140_v48 }
 0x33e   :  { %1173 = vmatprep.subr.mxu0 %v4141_v50  ;;  %1244 = vmatprep.subr.mxu1 %v4142_v22 }
 0x33f   :  { %1174 = vmatpush1.msra.mxu0 %v4143_v54  ;;  %1245 = vmatpush1.msra.mxu1 %v4144_v56 }
 0x340   :  { %1175 = vmatprep.subr.mxu0 %v4145_v58  ;;  %1246 = vmatprep.subr.mxu1 %v4146_v32 }
 0x341   :  { %1176 = vmatpush1.msra.mxu0 %v3421_v60  ;;  %1209 = vmatprep.mubr.f32.mxu0 %v4148_v1 }
 0x342   :  { %1247 = vmatpush1.msra.mxu1 %v4149_v61  ;;  %1280 = vmatprep.mubr.f32.mxu1 %v4148_v1 }
 0x343   :  { %1318 = vmatprep.subr.mxu0 %v4150_v6  ;;  %1389 = vmatprep.subr.mxu1 %v4151_v10 }
 0x3e2   :  { %v1038_v13 = vpop.f32.mrf.mxu0  ;;  %v1109_v63 = vpop.f32.mrf.mxu1 }
 0x3e3   :  { %v1114_v42 = vadd.f32 %v1038_v13, %v4152_v17  ;;  %v1116_v55 = vadd.f32 %v1109_v63, %v4154_v59  ;;  %v3452_v17 = vld [vmem:[%s3916_s2 + $0x1d8] sm:$0xff]  ;;  %v3501_v59 = vld [vmem:[%s3916_s2 + $0x170] sm:$0xff] }
 0x3e4   :  { %v1040_v7 = vpop.f32.mrf.mxu0  ;;  %v1111_v41 = vpop.f32.mrf.mxu1  ;;  %v3466_v63 = vld [vmem:[%s3916_s2 + $0x1b8] sm:$0xff] }
 0x3e5   :  { %v1118_v2 = vmul.f32 0.5, %v1114_v42  ;;  %v1115_v62 = vadd.f32 %v1040_v7, %v4153_v26  ;;  %v1117_v51 = vadd.f32 %v1111_v41, %v4155_v37  ;;  %v3459_v42 = vld [vmem:[%s3916_s2 + $0x1d0] sm:$0xff]  ;;  %v3522_v41 = vld [vmem:[%s3916_s2 + $0x138] sm:$0xff] }
 0x3e6   :  { %v3473_v7 = vld [vmem:[%s3916_s2 + $0x1b0] sm:$0xff] }
 0x3e7   :  { %2095 = vtanh.f32 %v1118_v2  ;;  %v1122_v29 = vmul.f32 0.5, %v1115_v62  ;;  %v1127_v5 = vmul.f32 0.5, %v1117_v51  ;;  %v3480_v2 = vld [vmem:[%s3916_s2 + $0x198] sm:$0xff]  ;;  %v3487_v26 = vld [vmem:[%s3916_s2 + $0x190] sm:$0xff] }
 0x3e8   :  { %v3494_v62 = vld [vmem:[%s3916_s2 + $0x178] sm:$0xff]  ;;  %v3529_v37 = vld [vmem:[%s3916_s2 + $0x130] sm:$0xff] }
 0x3e9   :  { %2097 = vtanh.f32 %v1122_v29  ;;  %v3515_v29 = vld [vmem:[%s3916_s2 + $0x150] sm:$0xff]  ;;  %v3536_v51 = vld [vmem:[%s3916_s2 + $0x118] sm:$0xff] }
 0x3ea   :  { %2099 = vtanh.f32 %v1116_v55  ;;  %v3508_v55 = vld [vmem:[%s3916_s2 + $0x158] sm:$0xff] }
 0x3eb   :  { %2101 = vtanh.f32 %v1127_v5  ;;  %v3543_v5 = vld [vmem:[%s3916_s2 + $0x110] sm:$0xff] }
 0x3f4   :  { %v2096_v9 = vpop.eup %2095 }
 0x3f5   :  { %v1120_v25 = vmul.f32 0.5, %v2096_v9  ;;  %v3550_v9 = vld [vmem:[%s3916_s2 + $0xf8] sm:$0xff] }
 0x3f6   :  { %v2098_v33 = vpop.eup %2097 }
 0x3f7   :  { %v1121_v28 = vadd.f32 0.5, %v1120_v25  ;;  %v1124_v34 = vmul.f32 0.5, %v2098_v33  ;;  %v2100_v0 = vpop.eup %2099  ;;  %v3557_v25 = vld [vmem:[%s3916_s2 + $0xf0] sm:$0xff]  ;;  %v3564_v33 = vld [vmem:[%s3916_s2 + $0xd8] sm:$0xff] }
 0x3f8   :  { %v2102_v56 = vpop.eup %2101 }
 0x3f9   :  { %v1125_v40 = vadd.f32 0.5, %v1124_v34  ;;  %v1132_v12 = vmul.f32 %v2100_v0, %v1121_v28  ;;  %v1129_v32 = vmul.f32 0.5, %v2102_v56  ;;  %v3571_v28 = vld [vmem:[%s3916_s2 + $0xd0] sm:$0xff]  ;;  %v3578_v34 = vld [vmem:[%s3916_s2 + $0xb8] sm:$0xff] }
 0x3fa   :  { %v3585_v0 = vld [vmem:[%s3916_s2 + $0xb0] sm:$0xff] }
 0x3fb   :  { %v1131_v48 = vmul.f32 %v1125_v40, %v3351_v4  ;;  %v1130_v61 = vadd.f32 0.5, %v1129_v32  ;;  %v3445_v4 = vld [vmem:[%s3916_s2 + $0x1f0] sm:$0xff]  ;;  %v3592_v40 = vld [vmem:[%s3916_s2 + $0x98] sm:$0xff] }
 0x3fc   :  { %4157 = vst [vmem:[#allocation30_spill] sm:$0xff] %v3592_v40  ;;  %v3613_v56 = vld [vmem:[%s3916_s2 + $0x70] sm:$0xff]  ;;  %v3620_v32 = vld [vmem:[%s3916_s2 + $0x58] sm:$0xff] }
 0x3fd   :  { %v3434_v22 = vadd.f32 %v1132_v12, %v1131_v48  ;;  %v3599_v12 = vld [vmem:[%s3916_s2 + $0x90] sm:$0xff]  ;;  %v3606_v48 = vld [vmem:[%s3916_s2 + $0x78] sm:$0xff]  ;;  %4160 = vst [vmem:[#allocation45_spill] sm:$0xff] %v3613_v56  ;;  %4161 = vst [vmem:[#allocation32_spill] sm:$0xff] %v3620_v32 }
 0x3fe   :  { %4158 = vst [vmem:[#allocation31_spill] sm:$0xff] %v3599_v12  ;;  %4159 = vst [vmem:[#allocation44_spill] sm:$0xff] %v3606_v48 }
 0x3ff   :  { %2103 = vtanh.f32 %v3434_v22 }
 0x40c   :  { %v2104_v10 = vpop.eup %2103 }
 0x40d   :  { %v3437_v13 = vmul.f32 %v2104_v10, %v1130_v61  ;;  %v3627_v61 = vld [vmem:[%s3916_s2 + $0x50] sm:$0xff]  ;;  %v3634_v10 = vld [vmem:[%s3916_s2 + $0x38] sm:$0xff] }
 0x40e   :  { %4162 = vst [vmem:[#allocation33_spill] sm:$0xff] %v3627_v61  ;;  %4163 = vst [vmem:[#allocation46_spill] sm:$0xff] %v3634_v10 }
 0x40f   :  { %4156 = vst [vmem:[#allocation16_spill] sm:$0xff] %v3437_v13  ;;  %1210 = vmatmul.mubr.f32.vlgmr.msra.gmra.mxu0 %v3437_v13  ;;  %1281 = vmatmul.mubr.f32.vlgmr.msra.gmra.mxu1 %v3437_v13  ;;  %v3641_v13 = vld [vmem:[%s3916_s2 + $0x30] sm:$0xff] }
 0x410   :  { %1319 = vmatpush1.msra.mxu0 %v3133_v20  ;;  %1390 = vmatpush1.msra.mxu1 %v3445_v4  ;;  %4164 = vst [vmem:[#allocation47_spill] sm:$0xff] %v3641_v13 }
 0x411   :  { %1320 = vmatprep.subr.mxu0 %v3140_v18  ;;  %1391 = vmatprep.subr.mxu1 %v3452_v17 }
 0x412   :  { %1321 = vmatpush1.msra.mxu0 %v3147_v14  ;;  %1392 = vmatpush1.msra.mxu1 %v3459_v42 }
 0x413   :  { %1322 = vmatprep.subr.mxu0 %v3154_v24  ;;  %1393 = vmatprep.subr.mxu1 %v3466_v63 }
 0x414   :  { %1323 = vmatpush1.msra.mxu0 %v3161_v52  ;;  %1394 = vmatpush1.msra.mxu1 %v3473_v7 }
 0x415   :  { %1324 = vmatprep.subr.mxu0 %v3168_v3  ;;  %1395 = vmatprep.subr.mxu1 %v3480_v2 }
 0x416   :  { %1325 = vmatpush1.msra.mxu0 %v3175_v53  ;;  %1396 = vmatpush1.msra.mxu1 %v3487_v26 }
 0x417   :  { %1326 = vmatprep.subr.mxu0 %v3182_v8  ;;  %1397 = vmatprep.subr.mxu1 %v3494_v62 }
 0x418   :  { %1327 = vmatpush1.msra.mxu0 %v3189_v11  ;;  %1398 = vmatpush1.msra.mxu1 %v3501_v59 }
 0x419   :  { %1328 = vmatprep.subr.mxu0 %v3196_v15  ;;  %1399 = vmatprep.subr.mxu1 %v3508_v55 }
 0x41a   :  { %1329 = vmatpush1.msra.mxu0 %v3203_v19  ;;  %1400 = vmatpush1.msra.mxu1 %v3515_v29 }
 0x41b   :  { %1330 = vmatprep.subr.mxu0 %v3210_v23  ;;  %1401 = vmatprep.subr.mxu1 %v3522_v41 }
 0x41c   :  { %1331 = vmatpush1.msra.mxu0 %v3217_v27  ;;  %1402 = vmatpush1.msra.mxu1 %v3529_v37 }
 0x41d   :  { %1332 = vmatprep.subr.mxu0 %v3224_v31  ;;  %1403 = vmatprep.subr.mxu1 %v3536_v51 }
 0x41e   :  { %1333 = vmatpush1.msra.mxu0 %v3231_v35  ;;  %1404 = vmatpush1.msra.mxu1 %v3543_v5 }
 0x41f   :  { %1334 = vmatprep.subr.mxu0 %v3238_v39  ;;  %1405 = vmatprep.subr.mxu1 %v3550_v9 }
 0x420   :  { %1335 = vmatpush1.msra.mxu0 %v3245_v43  ;;  %1406 = vmatpush1.msra.mxu1 %v3557_v25 }
 0x421   :  { %1336 = vmatprep.subr.mxu0 %v3252_v47  ;;  %1407 = vmatprep.subr.mxu1 %v3564_v33 }
 0x422   :  { %1337 = vmatpush1.msra.mxu0 %v3259_v16  ;;  %1408 = vmatpush1.msra.mxu1 %v3571_v28 }
 0x423   :  { %1338 = vmatprep.subr.mxu0 %v3266_v57  ;;  %1409 = vmatprep.subr.mxu1 %v3578_v34 }
 0x424   :  { %1339 = vmatpush1.msra.mxu0 %v3273_v49  ;;  %1410 = vmatpush1.msra.mxu1 %v3585_v0 }
 0x425   :  { %1340 = vmatprep.subr.mxu0 %v3280_v45  ;;  %1411 = vmatprep.subr.mxu1 %v3592_v40 }
 0x426   :  { %1341 = vmatpush1.msra.mxu0 %v4131_v30  ;;  %1412 = vmatpush1.msra.mxu1 %v3599_v12 }
 0x427   :  { %1342 = vmatprep.subr.mxu0 %v4133_v36  ;;  %1413 = vmatprep.subr.mxu1 %v3606_v48 }
 0x428   :  { %1343 = vmatpush1.msra.mxu0 %v4135_v38  ;;  %1414 = vmatpush1.msra.mxu1 %v3613_v56  ;;  %v4171_v56 = vld [vmem:[#allocation51_spill] sm:$0xff] }
 0x429   :  { %1344 = vmatprep.subr.mxu0 %v4137_v44  ;;  %1415 = vmatprep.subr.mxu1 %v3620_v32 }
 0x42a   :  { %1345 = vmatpush1.msra.mxu0 %v4139_v46  ;;  %1416 = vmatpush1.msra.mxu1 %v3627_v61  ;;  %v4169_v46 = vld [vmem:[#allocation37_spill] sm:$0xff] }
 0x42b   :  { %1346 = vmatprep.subr.mxu0 %v4141_v50  ;;  %1417 = vmatprep.subr.mxu1 %v3634_v10 }
 0x42c   :  { %1347 = vmatpush1.msra.mxu0 %v4143_v54  ;;  %1418 = vmatpush1.msra.mxu1 %v3641_v13  ;;  %v3656_v54 = vld [vmem:[%s3916_s2 + $0x10] sm:$0xff] }
 0x42d   :  { %1348 = vmatprep.subr.mxu0 %v4145_v58  ;;  %1419 = vmatprep.subr.mxu1 %v3648_v21  ;;  %4166 = vst [vmem:[#allocation21_spill] sm:$0xff] %v3656_v54  ;;  %v3664_v58 = vld [vmem:[%s3916_s2 + $0x1f8] sm:$0xff]  ;;  %v4168_v21 = vld [vmem:[#allocation36_spill] sm:$0xff] }
 0x42e   :  { %1349 = vmatpush1.msra.mxu0 %v3421_v60  ;;  %1382 = vmatprep.mubr.f32.mxu0 %v4148_v1  ;;  %4167 = vst [vmem:[#allocation22_spill] sm:$0xff] %v3664_v58 }
 0x42f   :  { %1420 = vmatpush1.msra.mxu1 %v3656_v54  ;;  %1453 = vmatprep.mubr.f32.mxu1 %v4148_v1  ;;  %v4170_v54 = vld [vmem:[#allocation50_spill] sm:$0xff] }
 0x430   :  { %1491 = vmatprep.subr.mxu0 %v4150_v6  ;;  %1562 = vmatprep.subr.mxu1 %v3664_v58 }
 0x4cf   :  { %v1211_v60 = vpop.f32.mrf.mxu0  ;;  %v1282_v10 = vpop.f32.mrf.mxu1 }
 0x4d0   :  { %v1287_v13 = vadd.f32 %v1211_v60, %v4168_v21  ;;  %v1289_v1 = vadd.f32 %v1282_v10, %v4170_v54  ;;  %v4183_v10 = vld [vmem:[#allocation33_spill] sm:$0xff] }
 0x4d1   :  { %v1213_v50 = vpop.f32.mrf.mxu0  ;;  %v1284_v6 = vpop.f32.mrf.mxu1 }
 0x4d2   :  { %v1291_v61 = vmul.f32 0.5, %v1287_v13  ;;  %v1288_v32 = vadd.f32 %v1213_v50, %v4169_v46  ;;  %v1290_v38 = vadd.f32 %v1284_v6, %v4171_v56  ;;  %v4180_v56 = vld [vmem:[#allocation9_spill] sm:$0xff] }
 0x4d4   :  { %2105 = vtanh.f32 %v1291_v61  ;;  %v1295_v44 = vmul.f32 0.5, %v1288_v32  ;;  %v1300_v48 = vmul.f32 0.5, %v1290_v38  ;;  %v4181_v32 = vld [vmem:[#allocation32_spill] sm:$0xff]  ;;  %v4182_v61 = vld [vmem:[#allocation10_spill] sm:$0xff] }
 0x4d6   :  { %2107 = vtanh.f32 %v1295_v44 }
 0x4d7   :  { %2109 = vtanh.f32 %v1289_v1 }
 0x4d8   :  { %2111 = vtanh.f32 %v1300_v48  ;;  %v4179_v48 = vld [vmem:[#allocation45_spill] sm:$0xff] }
 0x4e1   :  { %v2106_v36 = vpop.eup %2105 }
 0x4e2   :  { %v1293_v58 = vmul.f32 0.5, %v2106_v36  ;;  %v4174_v36 = vld [vmem:[#allocation19_spill] sm:$0xff] }
 0x4e3   :  { %v2108_v12 = vpop.eup %2107 }
 0x4e4   :  { %v1294_v30 = vadd.f32 0.5, %v1293_v58  ;;  %v1297_v21 = vmul.f32 0.5, %v2108_v12  ;;  %v2110_v60 = vpop.eup %2109  ;;  %v4175_v58 = vld [vmem:[#allocation31_spill] sm:$0xff]  ;;  %v4178_v12 = vld [vmem:[#allocation8_spill] sm:$0xff] }
 0x4e5   :  { %v2112_v44 = vpop.eup %2111 }
 0x4e6   :  { %v1298_v13 = vadd.f32 0.5, %v1297_v21  ;;  %v1305_v40 = vmul.f32 %v2110_v60, %v1294_v30  ;;  %v1302_v54 = vmul.f32 0.5, %v2112_v44  ;;  %v4173_v30 = vld [vmem:[#allocation30_spill] sm:$0xff]  ;;  %v4184_v21 = vld [vmem:[#allocation11_spill] sm:$0xff]  ;;  %v4188_v44 = vld [vmem:[#allocation13_spill] sm:$0xff] }
 0x4e7   :  { %v4185_v60 = vld [vmem:[#allocation46_spill] sm:$0xff] }
 0x4e8   :  { %v1304_v46 = vmul.f32 %v1298_v13, %v3434_v22  ;;  %v1303_v1 = vadd.f32 0.5, %v1302_v54  ;;  %v4176_v22 = vld [vmem:[#allocation7_spill] sm:$0xff]  ;;  %v4186_v13 = vld [vmem:[#allocation12_spill] sm:$0xff] }
 0x4e9   :  { %v4189_v54 = vld [vmem:[#allocation20_spill] sm:$0xff] }
 0x4ea   :  { %v3672_v50 = vadd.f32 %v1305_v40, %v1304_v46  ;;  %v4177_v40 = vld [vmem:[#allocation44_spill] sm:$0xff]  ;;  %v4187_v46 = vld [vmem:[#allocation47_spill] sm:$0xff] }
 0x4ec   :  { %2113 = vtanh.f32 %v3672_v50 }
 0x4f9   :  { %v2114_v6 = vpop.eup %2113 }
 0x4fa   :  { %v3675_v38 = vmul.f32 %v2114_v6, %v1303_v1  ;;  %v4190_v1 = vld [vmem:[#allocation15_spill] sm:$0xff]  ;;  %v4191_v6 = vmov 0.0  }
 0x4fc   :  { %4172 = vst [vmem:[#allocation23_spill] sm:$0xff] %v3675_v38  ;;  %1383 = vmatmul.mubr.f32.vlgmr.msra.gmra.mxu0 %v3675_v38  ;;  %1454 = vmatmul.mubr.f32.vlgmr.msra.gmra.mxu1 %v3675_v38  ;;  %v4192_v38 = vld [vmem:[#allocation21_spill] sm:$0xff] }
 0x4fd   :  { %1492 = vmatpush1.msra.mxu0 %v3133_v20  ;;  %1563 = vmatpush1.msra.mxu1 %v3445_v4 }
 0x4fe   :  { %1493 = vmatprep.subr.mxu0 %v3140_v18  ;;  %1564 = vmatprep.subr.mxu1 %v3452_v17 }
 0x4ff   :  { %1494 = vmatpush1.msra.mxu0 %v3147_v14  ;;  %1565 = vmatpush1.msra.mxu1 %v3459_v42 }
 0x500   :  { %1495 = vmatprep.subr.mxu0 %v3154_v24  ;;  %1566 = vmatprep.subr.mxu1 %v3466_v63 }
 0x501   :  { %1496 = vmatpush1.msra.mxu0 %v3161_v52  ;;  %1567 = vmatpush1.msra.mxu1 %v3473_v7 }
 0x502   :  { %1497 = vmatprep.subr.mxu0 %v3168_v3  ;;  %1568 = vmatprep.subr.mxu1 %v3480_v2 }
 0x503   :  { %1498 = vmatpush1.msra.mxu0 %v3175_v53  ;;  %1569 = vmatpush1.msra.mxu1 %v3487_v26 }
 0x504   :  { %1499 = vmatprep.subr.mxu0 %v3182_v8  ;;  %1570 = vmatprep.subr.mxu1 %v3494_v62 }
 0x505   :  { %1500 = vmatpush1.msra.mxu0 %v3189_v11  ;;  %1571 = vmatpush1.msra.mxu1 %v3501_v59 }
 0x506   :  { %1501 = vmatprep.subr.mxu0 %v3196_v15  ;;  %1572 = vmatprep.subr.mxu1 %v3508_v55 }
 0x507   :  { %1502 = vmatpush1.msra.mxu0 %v3203_v19  ;;  %1573 = vmatpush1.msra.mxu1 %v3515_v29 }
 0x508   :  { %1503 = vmatprep.subr.mxu0 %v3210_v23  ;;  %1574 = vmatprep.subr.mxu1 %v3522_v41 }
 0x509   :  { %1504 = vmatpush1.msra.mxu0 %v3217_v27  ;;  %1575 = vmatpush1.msra.mxu1 %v3529_v37 }
 0x50a   :  { %1505 = vmatprep.subr.mxu0 %v3224_v31  ;;  %1576 = vmatprep.subr.mxu1 %v3536_v51 }
 0x50b   :  { %1506 = vmatpush1.msra.mxu0 %v3231_v35  ;;  %1577 = vmatpush1.msra.mxu1 %v3543_v5 }
 0x50c   :  { %1507 = vmatprep.subr.mxu0 %v3238_v39  ;;  %1578 = vmatprep.subr.mxu1 %v3550_v9 }
 0x50d   :  { %1508 = vmatpush1.msra.mxu0 %v3245_v43  ;;  %1579 = vmatpush1.msra.mxu1 %v3557_v25 }
 0x50e   :  { %1509 = vmatprep.subr.mxu0 %v3252_v47  ;;  %1580 = vmatprep.subr.mxu1 %v3564_v33 }
 0x50f   :  { %1510 = vmatpush1.msra.mxu0 %v3259_v16  ;;  %1581 = vmatpush1.msra.mxu1 %v3571_v28 }
 0x510   :  { %1511 = vmatprep.subr.mxu0 %v3266_v57  ;;  %1582 = vmatprep.subr.mxu1 %v3578_v34 }
 0x511   :  { %1512 = vmatpush1.msra.mxu0 %v3273_v49  ;;  %1583 = vmatpush1.msra.mxu1 %v3585_v0 }
 0x512   :  { %1513 = vmatprep.subr.mxu0 %v3280_v45  ;;  %1584 = vmatprep.subr.mxu1 %v4173_v30 }
 0x513   :  { %1514 = vmatpush1.msra.mxu0 %v4174_v36  ;;  %1585 = vmatpush1.msra.mxu1 %v4175_v58 }
 0x514   :  { %1515 = vmatprep.subr.mxu0 %v4176_v22  ;;  %1586 = vmatprep.subr.mxu1 %v4177_v40 }
 0x515   :  { %1516 = vmatpush1.msra.mxu0 %v4178_v12  ;;  %1587 = vmatpush1.msra.mxu1 %v4179_v48 }
 0x516   :  { %1517 = vmatprep.subr.mxu0 %v4180_v56  ;;  %1588 = vmatprep.subr.mxu1 %v4181_v32  ;;  %v4196_v56 = vld [vmem:[#allocation39_spill] sm:$0xff] }
 0x517   :  { %1518 = vmatpush1.msra.mxu0 %v4182_v61  ;;  %1589 = vmatpush1.msra.mxu1 %v4183_v10  ;;  %v4193_v10 = vld [vmem:[#allocation18_spill] sm:$0xff] }
 0x518   :  { %1519 = vmatprep.subr.mxu0 %v4184_v21  ;;  %1590 = vmatprep.subr.mxu1 %v4185_v60  ;;  %v4194_v21 = vld [vmem:[#allocation22_spill] sm:$0xff] }
 0x519   :  { %1520 = vmatpush1.msra.mxu0 %v4186_v13  ;;  %1591 = vmatpush1.msra.mxu1 %v4187_v46  ;;  %v4195_v13 = vld [vmem:[#allocation38_spill] sm:$0xff] }
 0x51a   :  { %1521 = vmatprep.subr.mxu0 %v4188_v44  ;;  %1592 = vmatprep.subr.mxu1 %v4189_v54 }
 0x51b   :  { %1522 = vmatpush1.msra.mxu0 %v4190_v1  ;;  %1555 = vmatprep.mubr.f32.mxu0 %v4191_v6  ;;  %v4197_v1 = vld [vmem:[#allocation52_spill] sm:$0xff] }
 0x51c   :  { %1593 = vmatpush1.msra.mxu1 %v4192_v38  ;;  %1626 = vmatprep.mubr.f32.mxu1 %v4191_v6  ;;  %v4198_v6 = vld [vmem:[#allocation53_spill] sm:$0xff] }
 0x51d   :  { %1664 = vmatprep.subr.mxu0 %v4193_v10  ;;  %1735 = vmatprep.subr.mxu1 %v4194_v21 }
 0x5bc   :  { %v1384_v60 = vpop.f32.mrf.mxu0  ;;  %v1455_v46 = vpop.f32.mrf.mxu1 }
 0x5bd   :  { %v1460_v61 = vadd.f32 %v1384_v60, %v4195_v13  ;;  %v1462_v48 = vadd.f32 %v1455_v46, %v4197_v1 }
 0x5be   :  { %v1386_v32 = vpop.f32.mrf.mxu0  ;;  %v1457_v38 = vpop.f32.mrf.mxu1 }
 0x5bf   :  { %v1464_v44 = vmul.f32 0.5, %v1460_v61  ;;  %v1461_v54 = vadd.f32 %v1386_v32, %v4196_v56  ;;  %v1463_v40 = vadd.f32 %v1457_v38, %v4198_v6  ;;  %v1854_v6 = vld [vmem:[%s3919_s4 + $0x70] sm:$0xff] }
 0x5c1   :  { %2115 = vtanh.f32 %v1464_v44  ;;  %v1468_v12 = vmul.f32 0.5, %v1461_v54  ;;  %v1473_v10 = vmul.f32 0.5, %v1463_v40 }
 0x5c3   :  { %2117 = vtanh.f32 %v1468_v12 }
 0x5c4   :  { %2119 = vtanh.f32 %v1462_v48 }
 0x5c5   :  { %2121 = vtanh.f32 %v1473_v10  ;;  %v4223_v10 = vld [vmem:[#allocation58_spill] sm:$0xff] }
 0x5ce   :  { %v2116_v22 = vpop.eup %2115 }
 0x5cf   :  { %v1466_v21 = vmul.f32 0.5, %v2116_v22 }
 0x5d0   :  { %v2118_v58 = vpop.eup %2117 }
 0x5d1   :  { %v1467_v36 = vadd.f32 0.5, %v1466_v21  ;;  %v1470_v60 = vmul.f32 0.5, %v2118_v58  ;;  %v2120_v13 = vpop.eup %2119  ;;  %v1853_v21 = vld [vmem:[%s3919_s4 + $0x68] sm:$0xff] }
 0x5d2   :  { %v2122_v12 = vpop.eup %2121 }
 0x5d3   :  { %v1471_v61 = vadd.f32 0.5, %v1470_v60  ;;  %v1478_v30 = vmul.f32 %v2120_v13, %v1467_v36  ;;  %v1475_v48 = vmul.f32 0.5, %v2122_v12  ;;  %v1852_v60 = vld [vmem:[%s3919_s4 + $0x60] sm:$0xff]  ;;  %v1851_v13 = vld [vmem:[%s3919_s4 + $0x58] sm:$0xff] }
 0x5d4   :  { %v1847_v12 = vld [vmem:[%s3919_s4 + $0x38] sm:$0xff] }
 0x5d5   :  { %v1477_v56 = vmul.f32 %v1471_v61, %v3672_v50  ;;  %v1476_v46 = vadd.f32 0.5, %v1475_v48  ;;  %v1850_v61 = vld [vmem:[%s3919_s4 + $0x50] sm:$0xff] }
 0x5d6   :  { %v1846_v48 = vld [vmem:[%s3919_s4 + $0x30] sm:$0xff] }
 0x5d7   :  { %v3750_v32 = vadd.f32 %v1478_v30, %v1477_v56  ;;  %v1849_v56 = vld [vmem:[%s3919_s4 + $0x48] sm:$0xff] }
 0x5d9   :  { %2123 = vtanh.f32 %v3750_v32 }
 0x5e6   :  { %v2124_v38 = vpop.eup %2123 }
 0x5e7   :  { %v3753_v40 = vmul.f32 %v2124_v38, %v1476_v46  ;;  %v1845_v46 = vld [vmem:[%s3919_s4 + $0x28] sm:$0xff]  ;;  %v1844_v38 = vld [vmem:[%s3919_s4 + $0x20] sm:$0xff] }
 0x5e9   :  { %1556 = vmatmul.mubr.f32.vlgmr.msra.gmra.mxu0 %v3753_v40  ;;  %1627 = vmatmul.mubr.f32.vlgmr.msra.gmra.mxu1 %v3753_v40 }
 0x5ea   :  { %1665 = vmatpush1.msra.mxu0 %v3133_v20  ;;  %1736 = vmatpush1.msra.mxu1 %v3445_v4  ;;  %v4199_v20 = vld [vmem:[#allocation30_spill] sm:$0xff]  ;;  %v4219_v4 = vld [vmem:[#allocation40_spill] sm:$0xff] }
 0x5eb   :  { %1666 = vmatprep.subr.mxu0 %v3140_v18  ;;  %1737 = vmatprep.subr.mxu1 %v3452_v17  ;;  %v4200_v18 = vld [vmem:[#allocation19_spill] sm:$0xff] }
 0x5ec   :  { %1667 = vmatpush1.msra.mxu0 %v3147_v14  ;;  %1738 = vmatpush1.msra.mxu1 %v3459_v42  ;;  %v4201_v14 = vld [vmem:[#allocation31_spill] sm:$0xff] }
 0x5ed   :  { %1668 = vmatprep.subr.mxu0 %v3154_v24  ;;  %1739 = vmatprep.subr.mxu1 %v3466_v63  ;;  %v4202_v24 = vld [vmem:[#allocation7_spill] sm:$0xff] }
 0x5ee   :  { %1669 = vmatpush1.msra.mxu0 %v3161_v52  ;;  %1740 = vmatpush1.msra.mxu1 %v3473_v7  ;;  %v4203_v52 = vld [vmem:[#allocation44_spill] sm:$0xff] }
 0x5ef   :  { %1670 = vmatprep.subr.mxu0 %v3168_v3  ;;  %1741 = vmatprep.subr.mxu1 %v3480_v2  ;;  %v4204_v3 = vld [vmem:[#allocation8_spill] sm:$0xff]  ;;  %v4220_v2 = vld [vmem:[#allocation41_spill] sm:$0xff] }
 0x5f0   :  { %1671 = vmatpush1.msra.mxu0 %v3175_v53  ;;  %1742 = vmatpush1.msra.mxu1 %v3487_v26  ;;  %v4205_v53 = vld [vmem:[#allocation45_spill] sm:$0xff] }
 0x5f1   :  { %1672 = vmatprep.subr.mxu0 %v3182_v8  ;;  %1743 = vmatprep.subr.mxu1 %v3494_v62  ;;  %v4206_v8 = vld [vmem:[#allocation9_spill] sm:$0xff]  ;;  %v4221_v62 = vld [vmem:[#allocation54_spill] sm:$0xff] }
 0x5f2   :  { %1673 = vmatpush1.msra.mxu0 %v3189_v11  ;;  %1744 = vmatpush1.msra.mxu1 %v3501_v59  ;;  %v4207_v11 = vld [vmem:[#allocation32_spill] sm:$0xff] }
 0x5f3   :  { %1674 = vmatprep.subr.mxu0 %v3196_v15  ;;  %1745 = vmatprep.subr.mxu1 %v3508_v55  ;;  %v4208_v15 = vld [vmem:[#allocation10_spill] sm:$0xff] }
 0x5f4   :  { %1675 = vmatpush1.msra.mxu0 %v3203_v19  ;;  %1746 = vmatpush1.msra.mxu1 %v3515_v29  ;;  %v4209_v19 = vld [vmem:[#allocation33_spill] sm:$0xff] }
 0x5f5   :  { %1676 = vmatprep.subr.mxu0 %v3210_v23  ;;  %1747 = vmatprep.subr.mxu1 %v3522_v41  ;;  %v4210_v23 = vld [vmem:[#allocation11_spill] sm:$0xff] }
 0x5f6   :  { %1677 = vmatpush1.msra.mxu0 %v3217_v27  ;;  %1748 = vmatpush1.msra.mxu1 %v3529_v37  ;;  %v4211_v27 = vld [vmem:[#allocation46_spill] sm:$0xff]  ;;  %v4222_v41 = vld [vmem:[#allocation55_spill] sm:$0xff] }
 0x5f7   :  { %1678 = vmatprep.subr.mxu0 %v3224_v31  ;;  %1749 = vmatprep.subr.mxu1 %v3536_v51  ;;  %v4212_v31 = vld [vmem:[#allocation12_spill] sm:$0xff] }
 0x5f8   :  { %1679 = vmatpush1.msra.mxu0 %v3231_v35  ;;  %1750 = vmatpush1.msra.mxu1 %v3543_v5  ;;  %v4213_v35 = vld [vmem:[#allocation47_spill] sm:$0xff] }
 0x5f9   :  { %1680 = vmatprep.subr.mxu0 %v3238_v39  ;;  %1751 = vmatprep.subr.mxu1 %v3550_v9  ;;  %v4214_v39 = vld [vmem:[#allocation13_spill] sm:$0xff] }
 0x5fa   :  { %1681 = vmatpush1.msra.mxu0 %v3245_v43  ;;  %1752 = vmatpush1.msra.mxu1 %v3557_v25  ;;  %v4215_v43 = vld [vmem:[#allocation20_spill] sm:$0xff] }
 0x5fb   :  { %1682 = vmatprep.subr.mxu0 %v3252_v47  ;;  %1753 = vmatprep.subr.mxu1 %v3564_v33  ;;  %v4216_v47 = vld [vmem:[#allocation15_spill] sm:$0xff] }
 0x5fc   :  { %1683 = vmatpush1.msra.mxu0 %v3259_v16  ;;  %1754 = vmatpush1.msra.mxu1 %v3571_v28  ;;  %v4217_v16 = vmov 0.0  }
 0x5fd   :  { %1684 = vmatprep.subr.mxu0 %v3266_v57  ;;  %1755 = vmatprep.subr.mxu1 %v3578_v34  ;;  %v4218_v57 = vld [vmem:[#allocation21_spill] sm:$0xff] }
 0x5fe   :  { %1685 = vmatpush1.msra.mxu0 %v3273_v49  ;;  %1756 = vmatpush1.msra.mxu1 %v3585_v0  ;;  %v1855_v49 = vld [vmem:[%s3919_s4 + $0x78] sm:$0xff] }
 0x5ff   :  { %1686 = vmatprep.subr.mxu0 %v3280_v45  ;;  %1757 = vmatprep.subr.mxu1 %v4199_v20  ;;  %v1843_v20 = vld [vmem:[%s3919_s4 + $0x18] sm:$0xff] }
 0x600   :  { %1687 = vmatpush1.msra.mxu0 %v4200_v18  ;;  %1758 = vmatpush1.msra.mxu1 %v4201_v14  ;;  %v1842_v18 = vld [vmem:[%s3919_s4 + $0x10] sm:$0xff]  ;;  %v1841_v14 = vld [vmem:[%s3919_s4 + $0x8] sm:$0xff] }
 0x601   :  { %1688 = vmatprep.subr.mxu0 %v4202_v24  ;;  %1759 = vmatprep.subr.mxu1 %v4203_v52  ;;  %v1840_v24 = vld [vmem:[%s3919_s4] sm:$0xff] }
 0x602   :  { %1689 = vmatpush1.msra.mxu0 %v4204_v3  ;;  %1760 = vmatpush1.msra.mxu1 %v4205_v53  ;;  %v4224_v52 = vld [vmem:[#allocation6_spill] sm:$0xff]  ;;  %v4226_v53 = vld [vmem:[#allocation16_spill] sm:$0xff] }
 0x603   :  { %1690 = vmatprep.subr.mxu0 %v4206_v8  ;;  %1761 = vmatprep.subr.mxu1 %v4207_v11  ;;  %v4225_v3 = vld [vmem:[#allocation14_spill] sm:$0xff]  ;;  %v4227_v8 = vld [vmem:[#allocation23_spill] sm:$0xff] }
 0x604   :  { %1691 = vmatpush1.msra.mxu0 %v4208_v15  ;;  %1762 = vmatpush1.msra.mxu1 %v4209_v19  ;;  %v4228_v15 = vld [vmem:[#allocation42_spill] sm:$0xff] }
 0x605   :  { %1692 = vmatprep.subr.mxu0 %v4210_v23  ;;  %1763 = vmatprep.subr.mxu1 %v4211_v27 }
 0x606   :  { %1693 = vmatpush1.msra.mxu0 %v4212_v31  ;;  %1764 = vmatpush1.msra.mxu1 %v4213_v35  ;;  %v4229_v35 = vld [vmem:[#allocation43_spill] sm:$0xff] }
 0x607   :  { %1694 = vmatprep.subr.mxu0 %v4214_v39  ;;  %1765 = vmatprep.subr.mxu1 %v4215_v43  ;;  %v4230_v43 = vld [vmem:[#allocation56_spill] sm:$0xff] }
 0x608   :  { %1695 = vmatpush1.msra.mxu0 %v4216_v47  ;;  %1728 = vmatprep.mubr.f32.mxu0 %v4217_v16 }
 0x609   :  { %1766 = vmatpush1.msra.mxu1 %v4218_v57  ;;  %1799 = vmatprep.mubr.f32.mxu1 %v4217_v16 }
 0x60a   :  { %2020 = vmatprep.subr.mxu0 %v1855_v49 }
 0x6a9   :  { %v1557_v45 = vpop.f32.mrf.mxu0  ;;  %v1628_v42 = vpop.f32.mrf.mxu1 }
 0x6aa   :  { %v1633_v17 = vadd.f32 %v1557_v45, %v4219_v4  ;;  %v1635_v59 = vadd.f32 %v1628_v42, %v4221_v62 }
 0x6ab   :  { %v1559_v63 = vpop.f32.mrf.mxu0  ;;  %v1630_v29 = vpop.f32.mrf.mxu1 }
 0x6ac   :  { %v1637_v7 = vmul.f32 0.5, %v1633_v17  ;;  %v1634_v26 = vadd.f32 %v1559_v63, %v4220_v2  ;;  %v1636_v37 = vadd.f32 %v1630_v29, %v4222_v41  ;;  %v1995_v29 = vld [vmem:[%s3920_s5] ss:$0 sm:$0xff] }
 0x6ae   :  { %2125 = vtanh.f32 %v1637_v7  ;;  %v1641_v55 = vmul.f32 0.5, %v1634_v26  ;;  %v1646_v51 = vmul.f32 0.5, %v1636_v37 }
 0x6b0   :  { %2127 = vtanh.f32 %v1641_v55 }
 0x6b1   :  { %2129 = vtanh.f32 %v1635_v59 }
 0x6b2   :  { %2131 = vtanh.f32 %v1646_v51 }
 0x6bb   :  { %v2126_v5 = vpop.eup %2125 }
 0x6bc   :  { %v1639_v9 = vmul.f32 0.5, %v2126_v5 }
 0x6bd   :  { %v2128_v25 = vpop.eup %2127 }
 0x6be   :  { %v1640_v33 = vadd.f32 0.5, %v1639_v9  ;;  %v1643_v28 = vmul.f32 0.5, %v2128_v25  ;;  %v2130_v34 = vpop.eup %2129 }
 0x6bf   :  { %v2132_v58 = vpop.eup %2131 }
 0x6c0   :  { %v1644_v0 = vadd.f32 0.5, %v1643_v28  ;;  %v1651_v50 = vmul.f32 %v2130_v34, %v1640_v33  ;;  %v1648_v22 = vmul.f32 0.5, %v2132_v58 }
 0x6c2   :  { %v1650_v30 = vmul.f32 %v1644_v0, %v3750_v32  ;;  %v1649_v44 = vadd.f32 0.5, %v1648_v22  ;;  %v1848_v32 = vld [vmem:[%s3919_s4 + $0x40] sm:$0xff] }
 0x6c4   :  { %v3829_v36 = vadd.f32 %v1651_v50, %v1650_v30 }
 0x6c6   :  { %2133 = vtanh.f32 %v3829_v36 }
 0x6d3   :  { %v2134_v54 = vpop.eup %2133 }
 0x6d4   :  { %v1654_v1 = vmul.f32 %v2134_v54, %v1649_v44 }
 0x6d6   :  { %1729 = vmatmul.mubr.f32.vlgmr.msra.gmra.mxu0 %v1654_v1  ;;  %1800 = vmatmul.mubr.f32.vlgmr.msra.gmra.mxu1 %v1654_v1 }
 0x6d7   :  { %2021 = vmatpush3.msra.mxu0 %v1855_v49  ;;  %2052 = vmatprep.mubr.f32.mxu0 %v4223_v10  ;;  %v4231_v49 = vld [vmem:[#allocation57_spill] sm:$0xff] }
 0x6d8   :  { %2022 = vmatprep.subr.mxu0 %v1854_v6 }
 0x6d9   :  { %2023 = vmatpush3.msra.mxu0 %v1854_v6 }
 0x6da   :  { %2024 = vmatprep.subr.mxu0 %v1853_v21 }
 0x6db   :  { %2025 = vmatpush3.msra.mxu0 %v1853_v21 }
 0x6dc   :  { %2026 = vmatprep.subr.mxu0 %v1852_v60 }
 0x6dd   :  { %2027 = vmatpush3.msra.mxu0 %v1852_v60 }
 0x6de   :  { %2028 = vmatprep.subr.mxu0 %v1851_v13 }
 0x6df   :  { %2029 = vmatpush3.msra.mxu0 %v1851_v13 }
 0x6e0   :  { %2030 = vmatprep.subr.mxu0 %v1850_v61 }
 0x6e1   :  { %2031 = vmatpush3.msra.mxu0 %v1850_v61 }
 0x6e2   :  { %2032 = vmatprep.subr.mxu0 %v1849_v56 }
 0x6e3   :  { %2033 = vmatpush3.msra.mxu0 %v1849_v56 }
 0x6e4   :  { %2034 = vmatprep.subr.mxu0 %v1848_v32 }
 0x6e5   :  { %2035 = vmatpush3.msra.mxu0 %v1848_v32 }
 0x6e6   :  { %2036 = vmatprep.subr.mxu0 %v1847_v12 }
 0x6e7   :  { %2037 = vmatpush3.msra.mxu0 %v1847_v12 }
 0x6e8   :  { %2038 = vmatprep.subr.mxu0 %v1846_v48 }
 0x6e9   :  { %2039 = vmatpush3.msra.mxu0 %v1846_v48 }
 0x6ea   :  { %2040 = vmatprep.subr.mxu0 %v1845_v46 }
 0x6eb   :  { %2041 = vmatpush3.msra.mxu0 %v1845_v46 }
 0x6ec   :  { %2042 = vmatprep.subr.mxu0 %v1844_v38 }
 0x6ed   :  { %2043 = vmatpush3.msra.mxu0 %v1844_v38 }
 0x6ee   :  { %2044 = vmatprep.subr.mxu0 %v1843_v20 }
 0x6ef   :  { %2045 = vmatpush3.msra.mxu0 %v1843_v20 }
 0x6f0   :  { %2046 = vmatprep.subr.mxu0 %v1842_v18 }
 0x6f1   :  { %2047 = vmatpush3.msra.mxu0 %v1842_v18 }
 0x6f2   :  { %2048 = vmatprep.subr.mxu0 %v1841_v14 }
 0x6f3   :  { %2049 = vmatpush3.msra.mxu0 %v1841_v14 }
 0x6f4   :  { %2050 = vmatprep.subr.mxu0 %v1840_v24 }
 0x6f5   :  { %2051 = vmatpush3.msra.mxu0 %v1840_v24 }
 0x6f6   :  { %2053 = vmatmul.mubr.f32.vlgmr.msra.gmra.mxu0 %v4224_v52 }
 0x6f7   :  { %2055 = vmatprep.mubr.f32.mxu0 %v4225_v3 }
 0x6fa   :  { %2056 = vmatmul.mubr.f32.gmra.mxu0 %v4226_v53 }
 0x6fb   :  { %2058 = vmatprep.mubr.f32.mxu0 %v4227_v8 }
 0x6fe   :  { %2059 = vmatmul.mubr.f32.gmra.mxu0 %v3753_v40 }
 0x6ff   :  { %2061 = vmatprep.mubr.f32.mxu0 %v1654_v1 }
 0x796   :  { %v1730_v11 = vpop.f32.mrf.mxu0  ;;  %v1801_v23 = vpop.f32.mrf.mxu1 }
 0x797   :  { %v1806_v19 = vadd.f32 %v1730_v11, %v4228_v15  ;;  %v1808_v47 = vadd.f32 %v1801_v23, %v4230_v43 }
 0x798   :  { %v1732_v27 = vpop.f32.mrf.mxu0  ;;  %v1803_v57 = vpop.f32.mrf.mxu1 }
 0x799   :  { %v1810_v31 = vmul.f32 0.5, %v1806_v19  ;;  %v1807_v39 = vadd.f32 %v1732_v27, %v4229_v35  ;;  %v1809_v45 = vadd.f32 %v1803_v57, %v4231_v49 }
 0x79b   :  { %2135 = vtanh.f32 %v1810_v31  ;;  %v1814_v16 = vmul.f32 0.5, %v1807_v39  ;;  %v1819_v4 = vmul.f32 0.5, %v1809_v45 }
 0x79d   :  { %2137 = vtanh.f32 %v1814_v16 }
 0x79e   :  { %2139 = vtanh.f32 %v1808_v47 }
 0x79f   :  { %2141 = vtanh.f32 %v1819_v4 }
 0x7a8   :  { %v2136_v40 = vpop.eup %2135 }
 0x7a9   :  { %v1812_v17 = vmul.f32 0.5, %v2136_v40 }
 0x7aa   :  { %v2138_v42 = vpop.eup %2137 }
 0x7ab   :  { %v1813_v63 = vadd.f32 0.5, %v1812_v17  ;;  %v1816_v7 = vmul.f32 0.5, %v2138_v42  ;;  %v2140_v2 = vpop.eup %2139 }
 0x7ac   :  { %v2142_v51 = vpop.eup %2141 }
 0x7ad   :  { %v1817_v26 = vadd.f32 0.5, %v1816_v7  ;;  %v1824_v62 = vmul.f32 %v2140_v2, %v1813_v63  ;;  %v1821_v33 = vmul.f32 0.5, %v2142_v51 }
 0x7af   :  { %v1823_v59 = vmul.f32 %v1817_v26, %v3829_v36  ;;  %v1822_v30 = vadd.f32 0.5, %v1821_v33 }
 0x7b1   :  { %v1825_v55 = vadd.f32 %v1824_v62, %v1823_v59 }
 0x7b3   :  { %2143 = vtanh.f32 %v1825_v55 }
 0x7b6   :  { %v2054_v41 = vpop.f32.mrf.mxu0 }
 0x7b7   :  { %v1935_v37 = vadd.f32 %v2054_v41, %v1995_v29 }
 0x7b8   :  { %v1929_v5 = vpop.f32.mrf.mxu0 }
 0x7b9   :  { %2145 = vtanh.f32 %v1935_v37  ;;  %v1930_v9 = vadd.f32 %v1995_v29, %v1929_v5 }
 0x7ba   :  { %v2057_v25 = vpop.f32.mrf.mxu0 }
 0x7bb   :  { %2147 = vtanh.f32 %v1930_v9  ;;  %v1945_v28 = vadd.f32 %v2057_v25, %v1995_v29 }
 0x7bc   :  { %v1939_v34 = vpop.f32.mrf.mxu0 }
 0x7bd   :  { %2149 = vtanh.f32 %v1945_v28  ;;  %v1940_v0 = vadd.f32 %v1995_v29, %v1939_v34 }
 0x7be   :  { %v2060_v50 = vpop.f32.mrf.mxu0 }
 0x7bf   :  { %2151 = vtanh.f32 %v1940_v0  ;;  %v1955_v36 = vadd.f32 %v2060_v50, %v1995_v29 }
 0x7c0   :  { %v2144_v58 = vpop.eup %2143  ;;  %v1949_v22 = vpop.f32.mrf.mxu0 }
 0x7c1   :  { %2153 = vtanh.f32 %v1955_v36  ;;  %v1950_v44 = vadd.f32 %v1995_v29, %v1949_v22  ;;  %v1827_v54 = vmul.f32 %v2144_v58, %v1822_v30 }
 0x7c3   :  { %2155 = vtanh.f32 %v1950_v44  ;;  %2062 = vmatmul.mubr.f32.gmra.mxu0 %v1827_v54 }
 0x7c6   :  { %v2146_v1 = vpop.eup %2145 }
 0x7c7   :  { %1977 = vst [vmem:[%s3921_s6 + $0x8] sm:$0xff] %v2146_v1 }
 0x7c8   :  { %v2148_v6 = vpop.eup %2147 }
 0x7c9   :  { %1976 = vst [vmem:[%s3921_s6] sm:$0xff] %v2148_v6 }
 0x7ca   :  { %v2150_v10 = vpop.eup %2149 }
 0x7cb   :  { %1979 = vst [vmem:[%s3921_s6 + $0x18] sm:$0xff] %v2150_v10 }
 0x7cc   :  { %v2152_v21 = vpop.eup %2151 }
 0x7cd   :  { %1978 = vst [vmem:[%s3921_s6 + $0x10] sm:$0xff] %v2152_v21 }
 0x7ce   :  { %v2154_v60 = vpop.eup %2153 }
 0x7cf   :  { %1981 = vst [vmem:[%s3921_s6 + $0x28] sm:$0xff] %v2154_v60 }
 0x7d0   :  { %v2156_v13 = vpop.eup %2155 }
 0x7d1   :  { %1980 = vst [vmem:[%s3921_s6 + $0x20] sm:$0xff] %v2156_v13 }
 0x883   :  { %v2063_v61 = vpop.f32.mrf.mxu0 }
 0x884   :  { %v1965_v56 = vadd.f32 %v2063_v61, %v1995_v29 }
 0x885   :  { %v1959_v32 = vpop.f32.mrf.mxu0 }
 0x886   :  { %2157 = vtanh.f32 %v1965_v56  ;;  %v1960_v12 = vadd.f32 %v1995_v29, %v1959_v32 }
 0x888   :  { %2159 = vtanh.f32 %v1960_v12 }
 0x893   :  { %v2158_v48 = vpop.eup %2157 }
 0x894   :  { %1983 = vst [vmem:[%s3921_s6 + $0x38] sm:$0xff] %v2158_v48 }
 0x895   :  { %v2160_v46 = vpop.eup %2159 }
 0x896   :  { %1982 = vst [vmem:[%s3921_s6 + $0x30] sm:$0xff] %v2160_v46 }

</bundles_post_ra>
